<compile_context>
chip_gen: v5e
topology: v5e:2x2
jax: 0.10.0
libtpu: 0.0.40
codegen_flags: <defaults>
</compile_context>

<pallas_src>
import time

import jax
import jax.numpy as jnp
import numpy as np
from jax import lax
from jax.experimental import pallas as pl
from jax.experimental.pallas import tpu as pltpu


# ----------------------------------------------------------------------------
# Generation-aware VMEM budget + tile selection
# ----------------------------------------------------------------------------
def _vmem_limit_bytes():
    """Scoped-VMEM limit to request, based on the chip's physical VMEM."""
    phys = None
    try:
        info = pltpu.get_tpu_info()
        phys = getattr(info, "vmem_capacity_bytes", None)
    except Exception:
        phys = None
    if phys is None:
        # Conservative default that is safe even on v7x (64 MiB physical).
        return 48 * 1024 * 1024
    if phys >= 128 * 1024 * 1024:     # v5e / v6e
        return 96 * 1024 * 1024
    return 48 * 1024 * 1024           # v7x


def _divisor_candidates(n, caps):
    out = [c for c in caps if c <= n and n % c == 0]
    return out if out else [n]        # full extent is always layout-legal


def _vmem_estimate(tm, tn, tk, eb_ab, with_k):
    """Rough double-buffered VMEM footprint for one grid step (bytes)."""
    a_panels = 2 * tm * tk * eb_ab
    b_panels = 2 * tn * tk * eb_ab
    k_out = (2 if with_k else 1) * tm * tn * 4
    epilogue_tmp = 8 * tm * tn * 4          # Mosaic elementwise temporaries (conservative)
    row_col = 2 * 2 * (tm * 128 * 4 + 8 * tn * 4)   # sq / smp blocks (padded)
    den_mk = 2 * 2 * tm * 128 * 4
    return a_panels + b_panels + k_out + epilogue_tmp + row_col + den_mk


def _choose_tiles(N, D, eb_ab, budget_bytes, with_k):
    """Pick (tm, tn, tk) minimizing modeled HBM traffic within the VMEM budget."""
    tm_cands = _divisor_candidates(N, (512, 384, 256, 192, 128, 64, 32, 16, 8))
    tn_cands = _divisor_candidates(N, (2048, 1536, 1024, 768, 512, 384, 256, 128))
    tk_cands = [D] + [c for c in (2048, 1536, 1024, 768, 512, 384, 256, 128)
                      if c < D and D % c == 0]

    best = None
    for tk in tk_cands:
        nk = D // tk
        for tn in tn_cands:
            nj = N // tn
            for tm in tm_cands:
                if _vmem_estimate(tm, tn, tk, eb_ab, with_k) > budget_bytes:
                    continue
                ni = N // tm
                # A panel re-reads vanish when the k axis collapses (tk == D).
                a_bytes = N * D * eb_ab * (1 if nk == 1 else nj)
                b_bytes = N * D * eb_ab * (1 if (nj * nk) == 1 else ni)
                k_bytes = N * N * 4 if with_k else 0
                steps = ni * nj * nk
                cost = a_bytes + b_bytes + k_bytes + steps * 250_000
                if ni % 2 != 0:      # prefer even i-steps for v7x dual-TC sharding
                    cost *= 1.05
                if best is None or cost < best[0]:
                    best = (cost, tm, tn, tk)
    if best is None:
        raise ValueError(
            f"No VMEM-feasible tiling for N={N}, D={D}; pad N to a multiple of "
            f"8 (rows) / 128 (cols) or reduce the feature dimension.")
    return best[1], best[2], best[3]


# ----------------------------------------------------------------------------
# Fused kernel body: Gram matmul + kernel function + masked row reductions
# ----------------------------------------------------------------------------
def _make_fused_body(kernel_options, *, multi_k, with_k):
    ktype = kernel_options["type"]

    def apply_kernel_fn(gram, sqr, sqc):
        if ktype in ("Gaussian", "Cauchy"):
            # squared norms hoisted out of the k-loop (wrapper inputs, f32)
            dist = jnp.maximum(sqr + sqc - 2.0 * gram, 0.0)
            if ktype == "Gaussian":
                t = float(kernel_options["t"])
                return jnp.exp(dist * (-1.0 / (2.0 * t * t)))
            sigma = float(kernel_options["sigma"])
            return 1.0 / (dist * (1.0 / sigma) + 1.0)   # exact reciprocal
        if ktype == "Linear":
            return gram
        if ktype == "Polynomial":
            a_c = float(kernel_options["a"])
            b_c = float(kernel_options["b"])
            d_c = float(kernel_options["d"])
            base = a_c * gram + b_c
            if d_c.is_integer() and d_c >= 1.0:
                # exponentiation by (static) squaring: VPU multiplies only
                e = int(d_c)
                result, p = None, base
                while e > 0:
                    if e & 1:
                        result = p if result is None else result * p
                    e >>= 1
                    if e:
                        p = p * p
                return result
            return jnp.power(base, d_c)
        if ktype == "Sigmoid":
            d_c = float(kernel_options["d"])
            c_c = float(kernel_options["c"])
            return jnp.tanh(d_c * gram + c_c)
        raise NotImplementedError(ktype)

    def body(a_ref, b_ref, sqr_ref, sqc_ref, smpr_ref, smpc_ref, *rest):
        if with_k:
            k_ref, den_ref, mk_ref = rest
            acc_ref = k_ref
        elif multi_k:
            den_ref, mk_ref, acc_ref = rest
            k_ref = None
        else:
            den_ref, mk_ref = rest
            k_ref = acc_ref = None

        ii = pl.program_id(0)
        jj = pl.program_id(1)

        def init_den_mk():
            den_ref[...] = jnp.zeros_like(den_ref)
            mk_ref[...] = jnp.zeros_like(mk_ref)

        def epilogue(gram):
            k_tile = apply_kernel_fn(gram, sqr_ref[...], sqc_ref[...])
            if with_k:
                k_ref[...] = k_tile
            blk_m, blk_n = k_tile.shape
            # masks generated on the fly (no dense N^2 mask arrays in HBM)
            row = ii * blk_m + lax.broadcasted_iota(jnp.int32, (blk_m, blk_n), 0)
            col = jj * blk_n + lax.broadcasted_iota(jnp.int32, (blk_m, blk_n), 1)
            off_diag = row != col                              # logits_mask
            same_smp = smpr_ref[...] == smpc_ref[...]          # (tm,1)==(1,tn)
            den_ref[...] += jnp.sum(
                jnp.where(off_diag, jnp.exp(k_tile), 0.0), axis=1, keepdims=True)
            mk_ref[...] += jnp.sum(
                jnp.where(jnp.logical_and(off_diag, same_smp), k_tile, 0.0),
                axis=1, keepdims=True)

        # Pure-MXU contraction on dim 1 of both operands (no transposed copy).
        part = lax.dot_general(
            a_ref[...], b_ref[...],
            dimension_numbers=(((1,), (1,)), ((), ())),
            preferred_element_type=jnp.float32,
        )

        if multi_k:
            kk = pl.program_id(2)
            nk = pl.num_programs(2)

            @pl.when(jnp.logical_and(jj == 0, kk == 0))
            def _():
                init_den_mk()

            # Direct store on the first k-step (no zero-init read-modify-write).
            @pl.when(kk == 0)
            def _():
                acc_ref[...] = part

            @pl.when(kk > 0)
            def _():
                acc_ref[...] += part

            @pl.when(kk == nk - 1)
            def _():
                epilogue(acc_ref[...])
        else:
            @pl.when(jj == 0)
            def _():
                init_den_mk()

            epilogue(part)   # single k-step: the MXU result feeds the epilogue directly

    return body


# ----------------------------------------------------------------------------
# Fused kernel call wrapper
# ----------------------------------------------------------------------------
def fused_kernel_and_row_reductions(features, kernel_options, num_smp, *,
                                    with_k=True, mxu_bf16=False,
                                    tile_override=None):
    """Returns (K (N,N) or None, den (N,1), mk (N,1)) in one pass over HBM.

    with_k=False keeps K only as the resident VMEM accumulator (never written
    to HBM) -- use it when the caller only needs the contrastive loss.
    mxu_bf16=True casts the MXU operands to bfloat16 (recommended on v5e/v6e);
    the hoisted squared norms stay f32.
    """
    N, D = features.shape
    feats_f32 = features.astype(jnp.float32)
    feats_mxu = feats_f32.astype(jnp.bfloat16) if mxu_bf16 else feats_f32
    eb_ab = 2 if mxu_bf16 else 4

    vmem_limit = _vmem_limit_bytes()
    if tile_override is not None:
        tm, tn, tk = tile_override
    else:
        tm, tn, tk = _choose_tiles(N, D, eb_ab, int(vmem_limit * 0.85), with_k)
    multi_k = (D // tk) > 1

    # Squared norms hoisted out of the k-reduction loop (cheap N x D pass, f32).
    sq = jnp.sum(feats_f32 * feats_f32, axis=1)
    sq_row = sq.reshape(N, 1)
    sq_col = sq.reshape(1, N)
    # Sample ids for the positive-pair mask (avoids vector modulo in-kernel).
    smp = jnp.arange(N, dtype=jnp.int32) % jnp.int32(num_smp)
    smp_row = smp.reshape(N, 1)
    smp_col = smp.reshape(1, N)

    body = _make_fused_body(kernel_options, multi_k=multi_k, with_k=with_k)
    vec = jax.ShapeDtypeStruct((N, 1), jnp.float32)

    if multi_k:
        grid = (N // tm, N // tn, D // tk)
        a_spec = pl.BlockSpec((tm, tk), lambda i, j, k: (i, k))
        b_spec = pl.BlockSpec((tn, tk), lambda i, j, k: (j, k))
        row_spec = pl.BlockSpec((tm, 1), lambda i, j, k: (i, 0))
        col_spec = pl.BlockSpec((1, tn), lambda i, j, k: (0, j))
        k_spec = pl.BlockSpec((tm, tn), lambda i, j, k: (i, j))
        dsem = ("parallel", "arbitrary", "arbitrary")
    else:
        grid = (N // tm, N // tn)
        a_spec = pl.BlockSpec((tm, tk), lambda i, j: (i, 0))
        b_spec = pl.BlockSpec((tn, tk), lambda i, j: (j, 0))
        row_spec = pl.BlockSpec((tm, 1), lambda i, j: (i, 0))
        col_spec = pl.BlockSpec((1, tn), lambda i, j: (0, j))
        k_spec = pl.BlockSpec((tm, tn), lambda i, j: (i, j))
        dsem = ("parallel", "arbitrary")

    in_specs = [a_spec, b_spec, row_spec, col_spec, row_spec, col_spec]
    if with_k:
        out_shape = (jax.ShapeDtypeStruct((N, N), jnp.float32), vec, vec)
        out_specs = [k_spec, row_spec, row_spec]
        scratch_shapes = []
    else:
        out_shape = (vec, vec)
        out_specs = [row_spec, row_spec]
        scratch_shapes = ([pltpu.VMEM((tm, tn), jnp.float32)] if multi_k else [])

    result = pl.pallas_call(
        body,
        out_shape=out_shape,
        grid_spec=pltpu.PrefetchScalarGridSpec(
            num_scalar_prefetch=0,
            grid=grid,
            in_specs=in_specs,
            out_specs=out_specs,
            scratch_shapes=scratch_shapes,
        ),
        compiler_params=pltpu.CompilerParams(
            dimension_semantics=dsem,
            vmem_limit_bytes=vmem_limit,
        ),
    )(feats_mxu, feats_mxu, sq_row, sq_col, smp_row, smp_col)

    if with_k:
        K, den, mk = result
        return K, den, mk
    den, mk = result
    return None, den, mk


# ----------------------------------------------------------------------------
# Full ConLoss.forward equivalent
# ----------------------------------------------------------------------------
def con_loss_forward(features_list, kernel_options, trade_off, num_class=10,
                     mxu_bf16=False):
    num_view = len(features_list)
    num_smp = features_list[0].shape[0]

    feats = jnp.concatenate(features_list, axis=0).astype(jnp.float32)  # (N, D)

    # --- hot path: fused kernel matrix + masked row reductions (Pallas) ---
    K, den, mk = fused_kernel_and_row_reductions(
        feats, kernel_options, num_smp, with_k=True, mxu_bf16=mxu_bf16)

    # mask.sum(1) == num_view - 1 for every row (same sample in other views).
    ms = float(num_view - 1)
    mean_log_prob_pos = -(mk[:, 0] / ms) + jnp.log(den[:, 0])
    loss_con = jnp.mean(mean_log_prob_pos)

    time1 = time.time()
    if trade_off != 0:
        blocks = jnp.stack(
            [K[i * num_smp:(i + 1) * num_smp, i * num_smp:(i + 1) * num_smp]
             for i in range(num_view)],
            axis=-1,
        )
        kernel = blocks.mean(axis=-1)
        # TODO(synk): the torch reference uses host np.linalg.eig; `kernel` is
        # symmetric so jnp.linalg.eigh gives the same eigenvalues/trace
        # (eigenvector signs / ordering of degenerate pairs may differ).
        vals, vecs = jnp.linalg.eigh(kernel)
        order = jnp.argsort(vals)[::-1]
        H = vecs[:, order[:num_class]]
        loss_extra = (jnp.trace(kernel) - jnp.trace(H.T @ kernel @ H)) / num_smp
        H_out = H / jnp.linalg.norm(H, axis=1, keepdims=True)
    else:
        loss_extra = jnp.zeros((1,), jnp.float32)
        H_out = None
    time_extra = time.time() - time1

    # NOTE: the torch reference returns K as a host numpy array; we return the
    # device array and leave the device->host copy to the caller.
    return loss_con, loss_extra, K, H_out, time_extra


# ----------------------------------------------------------------------------
# Pure-JAX reference (for correctness check of the Pallas hot path)
# ----------------------------------------------------------------------------
def _ref_forward(feats, mask, logits_mask, t):
    aa = jnp.sum(feats * feats, axis=1, keepdims=True)
    D = aa + aa.T - 2.0 * feats @ feats.T
    K = jnp.exp(-D / (2.0 * t * t))
    logits = jnp.exp(K)
    den = (logits * logits_mask).sum(1)
    mk = (mask * K).sum(1)
    log_prob = K - jnp.log(den[:, None])
    mlpp = -(mask * log_prob).sum(1) / mask.sum(1)
    return mlpp.mean(), K, den, mk


if __name__ == "__main__":
    num_view, num_smp, dim = 2, 64, 256
    num_class = 10
    kernel_options = {"type": "Gaussian", "t": 1.0}
    trade_off = 1.0

    key = jax.random.PRNGKey(0)
    keys = jax.random.split(key, num_view)
    features_list = [
        jax.random.normal(keys[v], (num_smp, dim), dtype=jnp.float32) * 0.1
        for v in range(num_view)
    ]

    loss_con, loss_extra, K, H_out, _ = con_loss_forward(
        features_list, kernel_options, trade_off, num_class=num_class
    )
    loss_con = jax.block_until_ready(loss_con)
    loss_extra = jax.block_until_ready(loss_extra)
    K = jax.block_until_ready(K)

    # Reference (pure JAX) for the hot path.
    feats = jnp.concatenate(features_list, axis=0)
    N = num_view * num_smp
    mask = jnp.tile(jnp.eye(num_smp, dtype=jnp.float32), (num_view, num_view))
    logits_mask = jnp.ones((N, N), jnp.float32) - jnp.eye(N, dtype=jnp.float32)
    mask = mask * logits_mask
    ref_loss, ref_K, ref_den, ref_mk = _ref_forward(
        feats, mask, logits_mask, kernel_options["t"])

    # 1) f32 path, auto-chosen tiles.
    assert np.allclose(np.asarray(K), np.asarray(ref_K), rtol=1e-4, atol=1e-4)
    assert np.allclose(float(loss_con), float(ref_loss), rtol=1e-4, atol=1e-5)

    # 2) loss-only variant: K stays in VMEM, never written to HBM.
    _, den2, mk2 = fused_kernel_and_row_reductions(
        feats, kernel_options, num_smp, with_k=False)
    den2 = jax.block_until_ready(den2)
    mk2 = jax.block_until_ready(mk2)
    assert np.allclose(np.asarray(den2[:, 0]), np.asarray(ref_den),
                       rtol=1e-4, atol=1e-4)
    assert np.allclose(np.asarray(mk2[:, 0]), np.asarray(ref_mk),
                       rtol=1e-4, atol=1e-4)

    # 3) multi-step k-reduction path (tk < D) exercised via tile override.
    K3, _, _ = fused_kernel_and_row_reductions(
        feats, kernel_options, num_smp, tile_override=(64, 128, 128))
    K3 = jax.block_until_ready(K3)
    assert np.allclose(np.asarray(K3), np.asarray(ref_K), rtol=1e-4, atol=1e-4)

    # 4) bf16 MXU inputs (recommended on v5e/v6e) -- looser tolerance.
    loss_bf16, _, _, _, _ = con_loss_forward(
        features_list, kernel_options, 0.0, num_class=num_class, mxu_bf16=True)
    loss_bf16 = jax.block_until_ready(loss_bf16)
    assert np.allclose(float(loss_bf16), float(ref_loss), rtol=5e-2, atol=5e-2)

    print("KERNEL_OK")
</pallas_src>

<mosaic_0001>
module attributes {stable_mosaic.version = 11 : i64} {
  func.func @body(%arg0: i32, %arg1: i32, %arg2: memref<128x256xf32, #tpu.memory_space<vmem>>, %arg3: memref<128x256xf32, #tpu.memory_space<vmem>>, %arg4: memref<128x1xf32, #tpu.memory_space<vmem>>, %arg5: memref<1x128xf32, #tpu.memory_space<vmem>>, %arg6: memref<128x1xi32, #tpu.memory_space<vmem>>, %arg7: memref<1x128xi32, #tpu.memory_space<vmem>>, %arg8: memref<128x128xf32, #tpu.memory_space<vmem>>, %arg9: memref<128x1xf32, #tpu.memory_space<vmem>>, %arg10: memref<128x1xf32, #tpu.memory_space<vmem>>) attributes {dimension_semantics = [#tpu.dimension_semantics<parallel>, #tpu.dimension_semantics<arbitrary>], iteration_bounds = array<i64: 1, 1>, scalar_prefetch = 0 : i64, scratch_operands = 0 : i64, tpu.core_type = #tpu.core_type<tc>, window_params = [{transform_indices = @transform_0, window_bounds = array<i64: 128, 256>}, {transform_indices = @transform_1, window_bounds = array<i64: 128, 256>}, {transform_indices = @transform_2, window_bounds = array<i64: 128, 1>}, {transform_indices = @transform_3, window_bounds = array<i64: 1, 128>}, {transform_indices = @transform_4, window_bounds = array<i64: 128, 1>}, {transform_indices = @transform_5, window_bounds = array<i64: 1, 128>}, {transform_indices = @transform_6, window_bounds = array<i64: 128, 128>}, {transform_indices = @transform_7, window_bounds = array<i64: 128, 1>}, {transform_indices = @transform_8, window_bounds = array<i64: 128, 1>}]} {
    %c0 = arith.constant 0 : index
    %c0_0 = arith.constant 0 : index
    %0 = vector.load %arg2[%c0, %c0_0] : memref<128x256xf32, #tpu.memory_space<vmem>>, vector<128x256xf32>
    %c0_1 = arith.constant 0 : index
    %c0_2 = arith.constant 0 : index
    %1 = vector.load %arg3[%c0_1, %c0_2] : memref<128x256xf32, #tpu.memory_space<vmem>>, vector<128x256xf32>
    %cst = arith.constant dense<0.000000e+00> : vector<128x128xf32>
    %2 = tpu.matmul %0, %1, %cst {dimension_numbers = #tpu.dot_dimension_numbers<[1], [1], [0], [0], [0, 0, 1, 0], [], []>} : vector<128x256xf32>, vector<128x256xf32>, vector<128x128xf32> -> vector<128x128xf32>
    %c0_i32 = arith.constant 0 : i32
    %3 = arith.cmpi eq, %arg1, %c0_i32 : i32
    %4 = arith.extui %3 : i1 to i32
    %c0_i32_3 = arith.constant 0 : i32
    %5 = arith.cmpi ne, %4, %c0_i32_3 : i32
    scf.if %5 {
      %cst_30 = arith.constant 0.000000e+00 : f32
      %50 = vector.broadcast %cst_30 : f32 to vector<128x1xf32>
      %c0_31 = arith.constant 0 : index
      %c0_32 = arith.constant 0 : index
      %51 = vector.load %arg9[%c0_31, %c0_32] : memref<128x1xf32, #tpu.memory_space<vmem>>, vector<128x1xf32>
      tpu.vector_store %arg9[%c0_31, %c0_32], %50 {strides = array<i32>} : memref<128x1xf32, #tpu.memory_space<vmem>>, vector<128x1xf32>,
      %cst_33 = arith.constant 0.000000e+00 : f32
      %52 = vector.broadcast %cst_33 : f32 to vector<128x1xf32>
      %c0_34 = arith.constant 0 : index
      %c0_35 = arith.constant 0 : index
      %53 = vector.load %arg10[%c0_34, %c0_35] : memref<128x1xf32, #tpu.memory_space<vmem>>, vector<128x1xf32>
      tpu.vector_store %arg10[%c0_34, %c0_35], %52 {strides = array<i32>} : memref<128x1xf32, #tpu.memory_space<vmem>>, vector<128x1xf32>,
    } else {
    }
    %c0_4 = arith.constant 0 : index
    %c0_5 = arith.constant 0 : index
    %6 = vector.load %arg4[%c0_4, %c0_5] : memref<128x1xf32, #tpu.memory_space<vmem>>, vector<128x1xf32>
    %c0_6 = arith.constant 0 : index
    %c0_7 = arith.constant 0 : index
    %7 = vector.load %arg5[%c0_6, %c0_7] : memref<1x128xf32, #tpu.memory_space<vmem>>, vector<1x128xf32>
    %8 = vector.broadcast %6 : vector<128x1xf32> to vector<128x128xf32>
    %9 = vector.broadcast %7 : vector<1x128xf32> to vector<128x128xf32>
    %10 = arith.addf %8, %9 : vector<128x128xf32>
    %cst_8 = arith.constant 2.000000e+00 : f32
    %11 = vector.broadcast %cst_8 : f32 to vector<128x128xf32>
    %12 = arith.mulf %11, %2 : vector<128x128xf32>
    %13 = arith.subf %10, %12 : vector<128x128xf32>
    %cst_9 = arith.constant 0.000000e+00 : f32
    %14 = vector.broadcast %cst_9 : f32 to vector<128x128xf32>
    %15 = arith.maximumf %13, %14 : vector<128x128xf32>
    %cst_10 = arith.constant -5.000000e-01 : f32
    %16 = vector.broadcast %cst_10 : f32 to vector<128x128xf32>
    %17 = arith.mulf %15, %16 : vector<128x128xf32>
    %18 = math.exp %17 : vector<128x128xf32>
    %c0_11 = arith.constant 0 : index
    %c0_12 = arith.constant 0 : index
    %19 = vector.load %arg8[%c0_11, %c0_12] : memref<128x128xf32, #tpu.memory_space<vmem>>, vector<128x128xf32>
    tpu.vector_store %arg8[%c0_11, %c0_12], %18 {strides = array<i32>} : memref<128x128xf32, #tpu.memory_space<vmem>>, vector<128x128xf32>,
    %c128_i32 = arith.constant 128 : i32
    %20 = arith.muli %arg0, %c128_i32 : i32
    %21 = tpu.iota {dimensions = array<i32: 0>} : vector<128x128xi32>
    %22 = vector.broadcast %20 : i32 to vector<128x128xi32>
    %23 = arith.addi %22, %21 : vector<128x128xi32>
    %c128_i32_13 = arith.constant 128 : i32
    %24 = arith.muli %arg1, %c128_i32_13 : i32
    %25 = tpu.iota {dimensions = array<i32: 1>} : vector<128x128xi32>
    %26 = vector.broadcast %24 : i32 to vector<128x128xi32>
    %27 = arith.addi %26, %25 : vector<128x128xi32>
    %28 = arith.cmpi ne, %23, %27 : vector<128x128xi32>
    %c0_14 = arith.constant 0 : index
    %c0_15 = arith.constant 0 : index
    %29 = vector.load %arg6[%c0_14, %c0_15] : memref<128x1xi32, #tpu.memory_space<vmem>>, vector<128x1xi32>
    %c0_16 = arith.constant 0 : index
    %c0_17 = arith.constant 0 : index
    %30 = vector.load %arg7[%c0_16, %c0_17] : memref<1x128xi32, #tpu.memory_space<vmem>>, vector<1x128xi32>
    %31 = vector.broadcast %29 : vector<128x1xi32> to vector<128x128xi32>
    %32 = vector.broadcast %30 : vector<1x128xi32> to vector<128x128xi32>
    %33 = arith.cmpi eq, %31, %32 : vector<128x128xi32>
    %c0_18 = arith.constant 0 : index
    %c0_19 = arith.constant 0 : index
    %34 = vector.load %arg9[%c0_18, %c0_19] : memref<128x1xf32, #tpu.memory_space<vmem>>, vector<128x1xf32>
    %35 = math.exp %18 : vector<128x128xf32>
    %cst_20 = arith.constant 0.000000e+00 : f32
    %36 = vector.broadcast %cst_20 : f32 to vector<128x128xf32>
    %37 = arith.select %28, %35, %36 : vector<128x128xi1>, vector<128x128xf32>
    %cst_21 = arith.constant dense<0.000000e+00> : vector<128xf32>
    %38 = vector.multi_reduction <add>, %37, %cst_21 [1] : vector<128x128xf32> to vector<128xf32>
    %39 = vector.shape_cast %38 : vector<128xf32> to vector<128x1xf32>
    %40 = arith.addf %34, %39 : vector<128x1xf32>
    %c0_22 = arith.constant 0 : index
    %c0_23 = arith.constant 0 : index
    %41 = vector.load %arg9[%c0_22, %c0_23] : memref<128x1xf32, #tpu.memory_space<vmem>>, vector<128x1xf32>
    tpu.vector_store %arg9[%c0_22, %c0_23], %40 {strides = array<i32>} : memref<128x1xf32, #tpu.memory_space<vmem>>, vector<128x1xf32>,
    %c0_24 = arith.constant 0 : index
    %c0_25 = arith.constant 0 : index
    %42 = vector.load %arg10[%c0_24, %c0_25] : memref<128x1xf32, #tpu.memory_space<vmem>>, vector<128x1xf32>
    %43 = arith.andi %28, %33 : vector<128x128xi1>
    %cst_26 = arith.constant 0.000000e+00 : f32
    %44 = vector.broadcast %cst_26 : f32 to vector<128x128xf32>
    %45 = arith.select %43, %18, %44 : vector<128x128xi1>, vector<128x128xf32>
    %cst_27 = arith.constant dense<0.000000e+00> : vector<128xf32>
    %46 = vector.multi_reduction <add>, %45, %cst_27 [1] : vector<128x128xf32> to vector<128xf32>
    %47 = vector.shape_cast %46 : vector<128xf32> to vector<128x1xf32>
    %48 = arith.addf %42, %47 : vector<128x1xf32>
    %c0_28 = arith.constant 0 : index
    %c0_29 = arith.constant 0 : index
    %49 = vector.load %arg10[%c0_28, %c0_29] : memref<128x1xf32, #tpu.memory_space<vmem>>, vector<128x1xf32>
    tpu.vector_store %arg10[%c0_28, %c0_29], %48 {strides = array<i32>} : memref<128x1xf32, #tpu.memory_space<vmem>>, vector<128x1xf32>,
    return
  }
  func.func @transform_0(%arg0: i32, %arg1: i32) -> (i32, i32) {
    %c0_i32 = arith.constant 0 : i32
    %c0_i32_0 = arith.constant 0 : i32
    return %arg0, %c0_i32 : i32, i32
  }
  func.func @transform_1(%arg0: i32, %arg1: i32) -> (i32, i32) {
    %c0_i32 = arith.constant 0 : i32
    %c0_i32_0 = arith.constant 0 : i32
    return %arg1, %c0_i32 : i32, i32
  }
  func.func @transform_2(%arg0: i32, %arg1: i32) -> (i32, i32) {
    %c0_i32 = arith.constant 0 : i32
    %c0_i32_0 = arith.constant 0 : i32
    return %arg0, %c0_i32 : i32, i32
  }
  func.func @transform_3(%arg0: i32, %arg1: i32) -> (i32, i32) {
    %c0_i32 = arith.constant 0 : i32
    %c0_i32_0 = arith.constant 0 : i32
    return %c0_i32, %arg1 : i32, i32
  }
  func.func @transform_4(%arg0: i32, %arg1: i32) -> (i32, i32) {
    %c0_i32 = arith.constant 0 : i32
    %c0_i32_0 = arith.constant 0 : i32
    return %arg0, %c0_i32 : i32, i32
  }
  func.func @transform_5(%arg0: i32, %arg1: i32) -> (i32, i32) {
    %c0_i32 = arith.constant 0 : i32
    %c0_i32_0 = arith.constant 0 : i32
    return %c0_i32, %arg1 : i32, i32
  }
  func.func @transform_6(%arg0: i32, %arg1: i32) -> (i32, i32) {
    %c0_i32 = arith.constant 0 : i32
    return %arg0, %arg1 : i32, i32
  }
  func.func @transform_7(%arg0: i32, %arg1: i32) -> (i32, i32) {
    %c0_i32 = arith.constant 0 : i32
    %c0_i32_0 = arith.constant 0 : i32
    return %arg0, %c0_i32 : i32, i32
  }
  func.func @transform_8(%arg0: i32, %arg1: i32) -> (i32, i32) {
    %c0_i32 = arith.constant 0 : i32
    %c0_i32_0 = arith.constant 0 : i32
    return %arg0, %c0_i32 : i32, i32
  }
}

</mosaic_0001>

<bundles_post_ra>
// kernel: tpu_custom_call.1
= control target key start
LH: loop header
LB: loop body
LE: loop exit
PB: predicated region body
PF: predicated region fallthrough
CT: control target
= control target key end

     0   :  { %14 = vsyncpa [#allocation3], 0  ;;  %s2082_s0 = inlined_call_operand.vmem [shape: f32[128,256], index: 0, kind: input, shape index: {}]   ;;  %s2083_s1 = inlined_call_operand.hbm [shape: f32[128,256], index: 1, kind: input, shape index: {}]   ;;  %s2084_s2 = inlined_call_operand.vmem [shape: f32[128,1], index: 2, kind: input, shape index: {}]   ;;  %s2085_s3 = inlined_call_operand.vmem [shape: f32[1,128], index: 3, kind: input, shape index: {}]   ;;  %s2086_s4 = inlined_call_operand.vmem [shape: s32[128,1], index: 4, kind: input, shape index: {}]   ;;  %s2087_s5 = inlined_call_operand.vmem [shape: s32[1,128], index: 5, kind: input, shape index: {}]   ;;  %s2088_s6 = inlined_call_operand.hbm [shape: f32[128,128], index: 6, kind: output, shape index: {0}]   ;;  %s2089_s7 = inlined_call_operand.vmem [shape: f32[128,1], index: 7, kind: output, shape index: {1}]   ;;  %s2090_s8 = inlined_call_operand.vmem [shape: f32[128,1], index: 8, kind: output, shape index: {2}]  }
   0x1   :  { %15 = vsyncpa [#allocation4], 0  ;;  %s22_s29 = sshll.u32 %s2083_s1, 4  ;;  %s1069_s30 = smov [#allocation2]   ;;  %s23_s29 = int_to_ptr.hbm [resolvable:$true] %s22_s29 }
   0x2   :  { %s24_s9 = sshll.u32 %s1069_s30, 4  ;;  %s1070_s10 = smov 256   ;;  %s25_s9 = int_to_ptr.vmem [resolvable:$true] %s24_s9 }
   0x3   :  { %s1071_s11 = smov 16  }
   0x4   :  { %30 = dma.hbm_to_vmem [thread:$0]  %s23_s29, 4096, %s25_s9, [#allocation3], %s1070_s10, %s1070_s10, %s1071_s11  }
   0x5   :  { %1065 = dma.done.wait [#allocation3], 4096  }
   0x6   :  { %1066 = vsyncadd [#allocation3], 4294963200  ;;  %v1072_v0 = vmov 0   ;;  %v276_v1 = vld [vmem:[%s2084_s2 + $0x10] sm:$0xff]  ;;  %v274_v2 = vld [vmem:[%s2084_s2] sm:$0xff]  ;;  %s1075_s30 = smov 128  }
   0x7   :  { %949 = vset.pattern.permute.xlu1 %v1072_v0  ;;  %948 = vset.pattern.permute.xlu0 %v1072_v0  ;;  %v105_v3 = vld [vmem:[#allocation2 + $0xf0] sm:$0xff]  ;;  %v106_v4 = vld [vmem:[#allocation2 + $0xf8] sm:$0xff]  ;;  %v103_v5 = vld [vmem:[#allocation2 + $0xe0] sm:$0xff]  ;;  %s1076_s9 = smov 8  }
   0x8   :  { %950 = vset.pattern.permute.xlu2 %v1072_v0  ;;  %303 = vperm.xlu1 %949, %v276_v1   ;;  %v104_v6 = vld [vmem:[#allocation2 + $0xe8] sm:$0xff]  ;;  %v278_v7 = vld [vmem:[%s2084_s2 + $0x20] sm:$0xff]  ;;  %v277_v8 = vld [vmem:[%s2084_s2 + $0x18] sm:$0xff] }
   0x9   :  { %293 = vperm.xlu0 %948, %v274_v2   ;;  %107 = vmatpush.xpose.msra.mxu0 %v105_v3  ;;  %v275_v9 = vld [vmem:[%s2084_s2 + $0x8] sm:$0xff]  ;;  %v101_v10 = vld [vmem:[#allocation2 + $0xd0] sm:$0xff]  ;;  %v102_v11 = vld [vmem:[#allocation2 + $0xd8] sm:$0xff] }
   0xa   :  { %908 = vmatpush.xpose.msra.mxu2 %v105_v3  ;;  %172 = vmatpush.xpose.msra.mxu1 %v106_v4  ;;  %v99_v12 = vld [vmem:[#allocation2 + $0xc0] sm:$0xff]  ;;  %v100_v13 = vld [vmem:[#allocation2 + $0xc8] sm:$0xff]  ;;  %v281_v15 = vld [vmem:[%s2084_s2 + $0x38] sm:$0xff] }
   0xb   :  { %924 = vmatpush.xpose.msra.mxu3 %v106_v4  ;;  %313 = vperm.xlu2 %950, %v278_v7   ;;  %v279_v14 = vld [vmem:[%s2084_s2 + $0x28] sm:$0xff]  ;;  %v280_v16 = vld [vmem:[%s2084_s2 + $0x30] sm:$0xff]  ;;  %v98_v18 = vld [vmem:[#allocation2 + $0xb8] sm:$0xff] }
   0xc   :  { %v97_v17 = vld [vmem:[#allocation2 + $0xb0] sm:$0xff]  ;;  %v95_v19 = vld [vmem:[#allocation2 + $0xa0] sm:$0xff]  ;;  %v96_v20 = vld [vmem:[#allocation2 + $0xa8] sm:$0xff] }
   0xd   :  { %108 = vmatpush.xpose.msra.mxu0 %v103_v5  ;;  %v282_v21 = vld [vmem:[%s2084_s2 + $0x40] sm:$0xff]  ;;  %v284_v22 = vld [vmem:[%s2084_s2 + $0x50] sm:$0xff]  ;;  %v283_v23 = vld [vmem:[%s2084_s2 + $0x48] sm:$0xff] }
   0xe   :  { %909 = vmatpush.xpose.msra.mxu2 %v103_v5  ;;  %173 = vmatpush.xpose.msra.mxu1 %v104_v6  ;;  %v93_v24 = vld [vmem:[#allocation2 + $0x90] sm:$0xff]  ;;  %v94_v25 = vld [vmem:[#allocation2 + $0x98] sm:$0xff]  ;;  %v91_v26 = vld [vmem:[#allocation2 + $0x80] sm:$0xff] }
   0xf   :  { %925 = vmatpush.xpose.msra.mxu3 %v104_v6  ;;  %v92_v27 = vld [vmem:[#allocation2 + $0x88] sm:$0xff]  ;;  %v285_v28 = vld [vmem:[%s2084_s2 + $0x58] sm:$0xff]  ;;  %v286_v30 = vld [vmem:[%s2084_s2 + $0x60] sm:$0xff] }
  0x10   :  { %308 = vperm.xlu1 %949, %v277_v8   ;;  %v287_v29 = vld [vmem:[%s2084_s2 + $0x68] sm:$0xff]  ;;  %v89_v31 = vld [vmem:[#allocation2 + $0x70] sm:$0xff]  ;;  %v90_v32 = vld [vmem:[#allocation2 + $0x78] sm:$0xff] }
  0x11   :  { %298 = vperm.xlu0 %948, %v275_v9   ;;  %109 = vmatpush.xpose.msra.mxu0 %v101_v10  ;;  %v87_v33 = vld [vmem:[#allocation2 + $0x60] sm:$0xff]  ;;  %v88_v34 = vld [vmem:[#allocation2 + $0x68] sm:$0xff]  ;;  %v288_v35 = vld [vmem:[%s2084_s2 + $0x70] sm:$0xff] }
  0x12   :  { %910 = vmatpush.xpose.msra.mxu2 %v101_v10  ;;  %174 = vmatpush.xpose.msra.mxu1 %v102_v11  ;;  %v558_v36 = vld [vmem:[%s2086_s4] sm:$0xff]  ;;  %v289_v37 = vld [vmem:[%s2084_s2 + $0x78] sm:$0xff]  ;;  %v85_v38 = vld [vmem:[#allocation2 + $0x50] sm:$0xff] }
  0x13   :  { %926 = vmatpush.xpose.msra.mxu3 %v102_v11  ;;  %318 = vperm.xlu2 %950, %v279_v14   ;;  %v86_v39 = vld [vmem:[#allocation2 + $0x58] sm:$0xff]  ;;  %v83_v40 = vld [vmem:[#allocation2 + $0x40] sm:$0xff]  ;;  %v84_v41 = vld [vmem:[#allocation2 + $0x48] sm:$0xff] }
  0x14   :  { %v559_v42 = vld [vmem:[%s2086_s4 + $0x8] sm:$0xff]  ;;  %v561_v43 = vld [vmem:[%s2086_s4 + $0x18] sm:$0xff]  ;;  %v560_v44 = vld [vmem:[%s2086_s4 + $0x10] sm:$0xff] }
  0x15   :  { %110 = vmatpush.xpose.msra.mxu0 %v99_v12  ;;  %v81_v45 = vld [vmem:[#allocation2 + $0x30] sm:$0xff]  ;;  %v82_v46 = vld [vmem:[#allocation2 + $0x38] sm:$0xff]  ;;  %v79_v47 = vld [vmem:[#allocation2 + $0x20] sm:$0xff] }
  0x16   :  { %911 = vmatpush.xpose.msra.mxu2 %v99_v12  ;;  %175 = vmatpush.xpose.msra.mxu1 %v100_v13  ;;  %v80_v48 = vld [vmem:[#allocation2 + $0x28] sm:$0xff]  ;;  %v562_v49 = vld [vmem:[%s2086_s4 + $0x20] sm:$0xff]  ;;  %v564_v50 = vld [vmem:[%s2086_s4 + $0x30] sm:$0xff] }
  0x17   :  { %927 = vmatpush.xpose.msra.mxu3 %v100_v13  ;;  %v563_v51 = vld [vmem:[%s2086_s4 + $0x28] sm:$0xff]  ;;  %v77_v52 = vld [vmem:[#allocation2 + $0x10] sm:$0xff]  ;;  %v78_v53 = vld [vmem:[#allocation2 + $0x18] sm:$0xff] }
  0x18   :  { %328 = vperm.xlu1 %949, %v281_v15   ;;  %v75_v54 = vld [vmem:[#allocation2] sm:$0xff]  ;;  %v76_v55 = vld [vmem:[#allocation2 + $0x8] sm:$0xff]  ;;  %v565_v56 = vld [vmem:[%s2086_s4 + $0x38] sm:$0xff] }
  0x19   :  { %323 = vperm.xlu0 %948, %v280_v16   ;;  %111 = vmatpush.xpose.msra.mxu0 %v97_v17  ;;  %v43_v57 = vld [vmem:[%s2082_s0] sm:$0xff]  ;;  %v44_v59 = vld [vmem:[%s2082_s0 + $0x8] sm:$0xff]  ;;  %v568_v63 = vld [vmem:[%s2086_s4 + $0x50] sm:$0xff] }
  0x1a   :  { %912 = vmatpush.xpose.msra.mxu2 %v97_v17  ;;  %176 = vmatpush.xpose.msra.mxu1 %v98_v18  ;;  %v59_v58 = vld [vmem:[%s2082_s0 + $0x80] sm:$0xff]  ;;  %v60_v60 = vld [vmem:[%s2082_s0 + $0x88] sm:$0xff]  ;;  %v45_v0 = vld [vmem:[%s2082_s0 + $0x10] sm:$0xff] }
  0x1b   :  { %928 = vmatpush.xpose.msra.mxu3 %v98_v18  ;;  %333 = vperm.xlu2 %950, %v282_v21   ;;  %v567_v61 = vld [vmem:[%s2086_s4 + $0x48] sm:$0xff]  ;;  %v566_v62 = vld [vmem:[%s2086_s4 + $0x40] sm:$0xff]  ;;  %v61_v1 = vld [vmem:[%s2082_s0 + $0x90] sm:$0xff] }
  0x1c   :  { %v46_v2 = vld [vmem:[%s2082_s0 + $0x18] sm:$0xff]  ;;  %v570_v4 = vld [vmem:[%s2086_s4 + $0x60] sm:$0xff]  ;;  %v571_v6 = vld [vmem:[%s2086_s4 + $0x68] sm:$0xff] }
  0x1d   :  { %112 = vmatpush.xpose.msra.mxu0 %v95_v19  ;;  %v62_v3 = vld [vmem:[%s2082_s0 + $0x98] sm:$0xff]  ;;  %v47_v7 = vld [vmem:[%s2082_s0 + $0x20] sm:$0xff]  ;;  %v48_v9 = vld [vmem:[%s2082_s0 + $0x28] sm:$0xff] }
  0x1e   :  { %913 = vmatpush.xpose.msra.mxu2 %v95_v19  ;;  %177 = vmatpush.xpose.msra.mxu1 %v96_v20  ;;  %v569_v5 = vld [vmem:[%s2086_s4 + $0x58] sm:$0xff]  ;;  %v63_v8 = vld [vmem:[%s2082_s0 + $0xa0] sm:$0xff]  ;;  %v64_v10 = vld [vmem:[%s2082_s0 + $0xa8] sm:$0xff] }
  0x1f   :  { %929 = vmatpush.xpose.msra.mxu3 %v96_v20  ;;  %v573_v11 = vld [vmem:[%s2086_s4 + $0x78] sm:$0xff]  ;;  %v572_v12 = vld [vmem:[%s2086_s4 + $0x70] sm:$0xff]  ;;  %v51_v17 = vld [vmem:[%s2082_s0 + $0x40] sm:$0xff] }
  0x20   :  { %343 = vperm.xlu1 %949, %v284_v22   ;;  %v49_v13 = vld [vmem:[%s2082_s0 + $0x30] sm:$0xff]  ;;  %v50_v15 = vld [vmem:[%s2082_s0 + $0x38] sm:$0xff]  ;;  %v67_v18 = vld [vmem:[%s2082_s0 + $0xc0] sm:$0xff] }
  0x21   :  { %338 = vperm.xlu0 %948, %v283_v23   ;;  %113 = vmatpush.xpose.msra.mxu0 %v93_v24  ;;  %v65_v14 = vld [vmem:[%s2082_s0 + $0xb0] sm:$0xff]  ;;  %v66_v16 = vld [vmem:[%s2082_s0 + $0xb8] sm:$0xff]  ;;  %v52_v19 = vld [vmem:[%s2082_s0 + $0x48] sm:$0xff] }
  0x22   :  { %914 = vmatpush.xpose.msra.mxu2 %v93_v24  ;;  %178 = vmatpush.xpose.msra.mxu1 %v94_v25  ;;  %v68_v20 = vld [vmem:[%s2082_s0 + $0xc8] sm:$0xff]  ;;  %v53_v22 = vld [vmem:[%s2082_s0 + $0x50] sm:$0xff]  ;;  %v54_v24 = vld [vmem:[%s2082_s0 + $0x58] sm:$0xff] }
  0x23   :  { %930 = vmatpush.xpose.msra.mxu3 %v94_v25  ;;  %348 = vperm.xlu2 %950, %v285_v28   ;;  %v69_v23 = vld [vmem:[%s2082_s0 + $0xd0] sm:$0xff]  ;;  %v70_v25 = vld [vmem:[%s2082_s0 + $0xd8] sm:$0xff]  ;;  %v71_v28 = vld [vmem:[%s2082_s0 + $0xe0] sm:$0xff] }
  0x25   :  { %114 = vmatpush.xpose.msra.mxu0 %v91_v26 }
  0x26   :  { %915 = vmatpush.xpose.msra.mxu2 %v91_v26  ;;  %179 = vmatpush.xpose.msra.mxu1 %v92_v27 }
  0x27   :  { %931 = vmatpush.xpose.msra.mxu3 %v92_v27  ;;  %v55_v27 = vld [vmem:[%s2082_s0 + $0x60] sm:$0xff] }
  0x28   :  { %358 = vperm.xlu1 %949, %v287_v29   ;;  %v56_v29 = vld [vmem:[%s2082_s0 + $0x68] sm:$0xff] }
  0x29   :  { %353 = vperm.xlu0 %948, %v286_v30   ;;  %115 = vmatpush.xpose.msra.mxu0 %v89_v31  ;;  %v72_v30 = vld [vmem:[%s2082_s0 + $0xe8] sm:$0xff] }
  0x2a   :  { %916 = vmatpush.xpose.msra.mxu2 %v89_v31  ;;  %180 = vmatpush.xpose.msra.mxu1 %v90_v32 }
  0x2b   :  { %932 = vmatpush.xpose.msra.mxu3 %v90_v32  ;;  %363 = vperm.xlu2 %950, %v288_v35   ;;  %v73_v35 = vld [vmem:[%s2082_s0 + $0xf0] sm:$0xff] }
  0x2d   :  { %116 = vmatpush.xpose.msra.mxu0 %v87_v33 }
  0x2e   :  { %917 = vmatpush.xpose.msra.mxu2 %v87_v33  ;;  %181 = vmatpush.xpose.msra.mxu1 %v88_v34 }
  0x2f   :  { %933 = vmatpush.xpose.msra.mxu3 %v88_v34  ;;  %v57_v34 = vld [vmem:[%s2082_s0 + $0x70] sm:$0xff] }
  0x30   :  { %576 = vperm.xlu1 %949, %v558_v36   ;;  %v58_v36 = vld [vmem:[%s2082_s0 + $0x78] sm:$0xff] }
  0x31   :  { %368 = vperm.xlu0 %948, %v289_v37   ;;  %117 = vmatpush.xpose.msra.mxu0 %v85_v38  ;;  %v74_v37 = vld [vmem:[%s2082_s0 + $0xf8] sm:$0xff]  ;;  %s1074_s0 = smov [#allocation5]  }
  0x32   :  { %918 = vmatpush.xpose.msra.mxu2 %v85_v38  ;;  %182 = vmatpush.xpose.msra.mxu1 %v86_v39  ;;  %s885_s18 = sshll.u32 %s1074_s0, 4  ;;  %s886_s18 = int_to_ptr.vmem [resolvable:$true] %s885_s18 }
  0x33   :  { %934 = vmatpush.xpose.msra.mxu3 %v86_v39  ;;  %579 = vperm.xlu2 %950, %v559_v42  }
  0x35   :  { %118 = vmatpush.xpose.msra.mxu0 %v83_v40 }
  0x36   :  { %919 = vmatpush.xpose.msra.mxu2 %v83_v40  ;;  %183 = vmatpush.xpose.msra.mxu1 %v84_v41 }
  0x37   :  { %935 = vmatpush.xpose.msra.mxu3 %v84_v41 }
  0x38   :  { %585 = vperm.xlu1 %949, %v561_v43  }
  0x39   :  { %582 = vperm.xlu0 %948, %v560_v44   ;;  %119 = vmatpush.xpose.msra.mxu0 %v81_v45  ;;  %v503_v44 = vlaneseq }
  0x3a   :  { %920 = vmatpush.xpose.msra.mxu2 %v81_v45  ;;  %184 = vmatpush.xpose.msra.mxu1 %v82_v46 }
  0x3b   :  { %936 = vmatpush.xpose.msra.mxu3 %v82_v46  ;;  %588 = vperm.xlu2 %950, %v562_v49   ;;  %v1345_v49 = vand.u32 127, %v503_v44 }
  0x3d   :  { %120 = vmatpush.xpose.msra.mxu0 %v79_v47 }
  0x3e   :  { %921 = vmatpush.xpose.msra.mxu2 %v79_v47  ;;  %185 = vmatpush.xpose.msra.mxu1 %v80_v48 }
  0x3f   :  { %937 = vmatpush.xpose.msra.mxu3 %v80_v48  ;;  %v1343_v48 = vshrl.u32 %v503_v44, 7 }
  0x40   :  { %594 = vperm.xlu1 %949, %v564_v50  }
  0x41   :  { %591 = vperm.xlu0 %948, %v563_v51   ;;  %121 = vmatpush.xpose.msra.mxu0 %v77_v52  ;;  %v1348_v50 = vadd.s32 48, %v1343_v48 }
  0x42   :  { %922 = vmatpush.xpose.msra.mxu2 %v77_v52  ;;  %186 = vmatpush.xpose.msra.mxu1 %v78_v53 }
  0x43   :  { %938 = vmatpush.xpose.msra.mxu3 %v78_v53  ;;  %597 = vperm.xlu2 %950, %v565_v56   ;;  %vm548_vm0 = vcmp.ne.s32.totalorder %v1348_v50, %v1345_v49 }
  0x45   :  { %122 = vmatpush.xpose.msra.mxu0 %v75_v54 }
  0x46   :  { %923 = vmatpush.xpose.msra.mxu2 %v75_v54  ;;  %187 = vmatpush.xpose.msra.mxu1 %v76_v55  ;;  %v1361_v54 = vld [vmem:[%s2085_s3] ss:$0 sm:$0xff]  ;;  %s887_s3 = sshll.u32 %s2088_s6, 4  ;;  %s888_s3 = int_to_ptr.hbm [resolvable:$true] %s887_s3 }
  0x47   :  { %939 = vmatpush.xpose.msra.mxu3 %v76_v55  ;;  %v1366_v55 = vld [vmem:[%s2087_s5] ss:$0 sm:$0xff] }
  0x48   :  { %123 = vmatmul.f32.vlgmr.msra.gmra.mxu0 %v43_v57  ;;  %603 = vperm.xlu1 %949, %v567_v61   ;;  %v1369_v57 = vadd.s32 56, %v1343_v48 }
  0x49   :  { %147 = vmatmul.f32.vlgmr.msra.gmra.mxu2 %v59_v58  ;;  %188 = vmatmul.f32.vlgmr.msra.gmra.mxu1 %v44_v59  ;;  %v1372_v58 = vadd.s32 104, %v1343_v48 }
  0x4a   :  { %212 = vmatmul.f32.vlgmr.msra.gmra.mxu3 %v60_v60  ;;  %600 = vperm.xlu0 %948, %v566_v62   ;;  %vm549_vm2 = vcmp.ne.s32.totalorder %v1369_v57, %v1345_v49 }
  0x4b   :  { %606 = vperm.xlu2 %950, %v568_v63   ;;  %vm2091_vm3 = vcmp.ne.s32.totalorder %v1372_v58, %v1345_v49 }
  0x50   :  { %126 = vmatmul.f32.gmra.mxu0 %v45_v0  ;;  %612 = vperm.xlu1 %949, %v570_v4  }
  0x51   :  { %150 = vmatmul.f32.gmra.mxu2 %v61_v1  ;;  %191 = vmatmul.f32.gmra.mxu1 %v46_v2  ;;  %v1398_v2 = vadd.s32 120, %v1343_v48 }
  0x52   :  { %215 = vmatmul.f32.gmra.mxu3 %v62_v3  ;;  %609 = vperm.xlu0 %948, %v569_v5   ;;  %v1401_v3 = vadd.s32 112, %v1343_v48 }
  0x53   :  { %615 = vperm.xlu2 %950, %v571_v6   ;;  %vm557_vm5 = vcmp.ne.s32.totalorder %v1398_v2, %v1345_v49 }
  0x54   :  { %vm2092_vm6 = vcmp.ne.s32.totalorder %v1401_v3, %v1345_v49 }
  0x58   :  { %129 = vmatmul.f32.gmra.mxu0 %v47_v7  ;;  %621 = vperm.xlu1 %949, %v573_v11  }
  0x59   :  { %153 = vmatmul.f32.gmra.mxu2 %v63_v8  ;;  %194 = vmatmul.f32.gmra.mxu1 %v48_v9 }
  0x5a   :  { %218 = vmatmul.f32.gmra.mxu3 %v64_v10  ;;  %618 = vperm.xlu0 %948, %v572_v12  }
  0x60   :  { %132 = vmatmul.f32.gmra.mxu0 %v49_v13 }
  0x61   :  { %156 = vmatmul.f32.gmra.mxu2 %v65_v14  ;;  %197 = vmatmul.f32.gmra.mxu1 %v50_v15 }
  0x62   :  { %221 = vmatmul.f32.gmra.mxu3 %v66_v16 }
  0x65   :  { %v1281_v21 = vpop.permute.xlu2 %313 }
  0x68   :  { %135 = vmatmul.f32.gmra.mxu0 %v51_v17 }
  0x69   :  { %159 = vmatmul.f32.gmra.mxu2 %v67_v18  ;;  %200 = vmatmul.f32.gmra.mxu1 %v52_v19 }
  0x6a   :  { %224 = vmatmul.f32.gmra.mxu3 %v68_v20 }
  0x6d   :  { %v1295_v26 = vpop.permute.xlu2 %318 }
  0x70   :  { %138 = vmatmul.f32.gmra.mxu0 %v53_v22 }
  0x71   :  { %162 = vmatmul.f32.gmra.mxu2 %v69_v23  ;;  %203 = vmatmul.f32.gmra.mxu1 %v54_v24 }
  0x72   :  { %227 = vmatmul.f32.gmra.mxu3 %v70_v25 }
  0x75   :  { %v1309_v31 = vpop.permute.xlu2 %333 }
  0x78   :  { %141 = vmatmul.f32.gmra.mxu0 %v55_v27 }
  0x79   :  { %165 = vmatmul.f32.gmra.mxu2 %v71_v28  ;;  %206 = vmatmul.f32.gmra.mxu1 %v56_v29 }
  0x7a   :  { %230 = vmatmul.f32.gmra.mxu3 %v72_v30  ;;  %v1311_v32 = vpop.permute.xlu1 %303 }
  0x7b   :  { %v294_v33 = vpop.permute.xlu0 %293 }
  0x7c   :  { %v374_v16 = vadd.f32 %v1361_v54, %v294_v33 }
  0x7d   :  { %v1325_v38 = vpop.permute.xlu2 %348 }
  0x80   :  { %144 = vmatmul.f32.gmra.mxu0 %v57_v34 }
  0x81   :  { %168 = vmatmul.f32.gmra.mxu2 %v73_v35  ;;  %209 = vmatmul.f32.gmra.mxu1 %v58_v36  ;;  %v382_v35 = vadd.f32 %v1361_v54, %v1309_v31 }
  0x82   :  { %233 = vmatmul.f32.gmra.mxu3 %v74_v37  ;;  %v1327_v39 = vpop.permute.xlu1 %308 }
  0x83   :  { %v1329_v40 = vpop.permute.xlu0 %298 }
  0x84   :  { %v375_v37 = vadd.f32 %v1361_v54, %v1329_v40 }
  0x85   :  { %v1331_v41 = vpop.permute.xlu2 %363 }
  0x8a   :  { %v1333_v42 = vpop.permute.xlu1 %328 }
  0x8b   :  { %v1335_v43 = vpop.permute.xlu0 %323 }
  0x8d   :  { %v1337_v45 = vpop.permute.xlu2 %579 }
  0x92   :  { %v1339_v46 = vpop.permute.xlu1 %343 }
  0x93   :  { %v1341_v47 = vpop.permute.xlu0 %338 }
  0x95   :  { %v1352_v51 = vpop.permute.xlu2 %588 }
  0x9a   :  { %v1354_v52 = vpop.permute.xlu1 %358 }
  0x9b   :  { %v1356_v53 = vpop.permute.xlu0 %353 }
  0x9d   :  { %v598_v56 = vpop.permute.xlu2 %597 }
  0x9e   :  { %vm631_vm1 = vcmp.eq.s32.totalorder %v598_v56, %v1366_v55 }
  0x9f   :  { %vm1387_vm4 = vmand %vm549_vm2, %vm631_vm1  ;;  %vm542_vm1 = vcmp.ne.s32.totalorder %v1343_v48, %v1345_v49 }
  0xa2   :  { %v1374_v59 = vpop.permute.xlu1 %576 }
  0xa3   :  { %v369_v60 = vpop.permute.xlu0 %368  ;;  %vm624_vm15 = vcmp.eq.s32.totalorder %v1374_v59, %v1366_v55  ;;  %v1466_v59 = vadd.s32 64, %v1343_v48 }
  0xa4   :  { %v1377_v61 = vadd.f32 %v1361_v54, %v369_v60 }
  0xa5   :  { %v1391_v63 = vpop.permute.xlu2 %606 }
  0xaa   :  { %v1393_v0 = vpop.permute.xlu1 %585 }
  0xab   :  { %v1395_v1 = vpop.permute.xlu0 %582 }
  0xad   :  { %v616_v4 = vpop.permute.xlu2 %615 }
  0xae   :  { %vm637_vm7 = vcmp.eq.s32.totalorder %v616_v4, %v1366_v55 }
  0xaf   :  { %vm1414_vm9 = vmand %vm2091_vm3, %vm637_vm7 }
  0xb0   :  { %vm785_vm7 = vmand %vm542_vm1, %vm624_vm15 }
  0xb2   :  { %v595_v5 = vpop.permute.xlu1 %594 }
  0xb3   :  { %v1407_v6 = vpop.permute.xlu0 %591  ;;  %vm630_vm8 = vcmp.eq.s32.totalorder %v595_v5, %v1366_v55 }
  0xb4   :  { %vm1421_vm10 = vmand %vm548_vm0, %vm630_vm8 }
  0xba   :  { %v1425_v9 = vpop.permute.xlu1 %603 }
  0xbc   :  { %v1427_v10 = vpop.permute.xlu0 %600 }
  0xbd   :  { %vm632_vm8 = vcmp.eq.s32.totalorder %v1427_v10, %v1366_v55 }
  0xc2   :  { %v1429_v11 = vpop.permute.xlu1 %612 }
  0xc4   :  { %v1431_v12 = vpop.permute.xlu0 %609 }
  0xc5   :  { %v124_v13 = vpop.f32.mrf.mxu0 }
  0xc6   :  { %v189_v14 = vpop.f32.mrf.mxu1 }
  0xc7   :  { %v190_v15 = vadd.f32 %v189_v14, %v124_v13 }
  0xc9   :  { %v390_v17 = vmul.f32 2.0, %v190_v15 }
  0xca   :  { %v622_v20 = vpop.permute.xlu1 %621 }
  0xcb   :  { %v406_v18 = vsub.f32 %v374_v16, %v390_v17  ;;  %vm639_vm11 = vcmp.eq.s32.totalorder %v622_v20, %v1366_v55  ;;  %v376_v20 = vadd.f32 %v1361_v54, %v1311_v32 }
  0xcc   :  { %v148_v19 = vpop.f32.mrf.mxu2  ;;  %v619_v22 = vpop.permute.xlu0 %618  ;;  %vm1446_vm14 = vmand %vm557_vm5, %vm639_vm11  ;;  %vm550_vm11 = vcmp.ne.s32.totalorder %v1466_v59, %v1345_v49 }
  0xcd   :  { %v422_v23 = vmax.f32 %v406_v18, 0.0  ;;  %vm638_vm12 = vcmp.eq.s32.totalorder %v619_v22, %v1366_v55  ;;  %v213_v24 = vpop.f32.mrf.mxu3  ;;  %v127_v25 = vpop.f32.mrf.mxu0  ;;  %v383_v22 = vadd.f32 %v1361_v54, %v1341_v47 }
  0xce   :  { %v214_v27 = vadd.f32 %v213_v24, %v148_v19  ;;  %v192_v28 = vpop.f32.mrf.mxu1  ;;  %vm1439_vm13 = vmand %vm2092_vm6, %vm638_vm12  ;;  %vm625_vm12 = vcmp.eq.s32.totalorder %v1337_v45, %v1366_v55 }
  0xcf   :  { %v438_v30 = vmul.f32 -0.5, %v422_v23  ;;  %v193_v33 = vadd.f32 %v192_v28, %v127_v25 }
  0xd0   :  { %v398_v36 = vmul.f32 2.0, %v214_v27 }
  0xd1   :  { %v454_v44 = vmul.f32 1.442695, %v438_v30  ;;  %v391_v56 = vmul.f32 2.0, %v193_v33  ;;  %v1469_v30 = vadd.s32 8, %v1343_v48 }
  0xd2   :  { %v414_v60 = vsub.f32 %v382_v35, %v398_v36 }
  0xd3   :  { %953 = vpow2.f32 %v454_v44  ;;  %v407_v4 = vsub.f32 %v375_v37, %v391_v56  ;;  %vm543_vm15 = vcmp.ne.s32.totalorder %v1469_v30, %v1345_v49 }
  0xd4   :  { %v151_v5 = vpop.f32.mrf.mxu2  ;;  %v430_v13 = vmax.f32 %v414_v60, 0.0  ;;  %vm786_vm3 = vmand %vm543_vm15, %vm625_vm12 }
  0xd5   :  { %v423_v14 = vmax.f32 %v407_v4, 0.0  ;;  %v216_v15 = vpop.f32.mrf.mxu3  ;;  %v130_v16 = vpop.f32.mrf.mxu0 }
  0xd6   :  { %v446_v17 = vmul.f32 -0.5, %v430_v13  ;;  %v217_v18 = vadd.f32 %v216_v15, %v151_v5  ;;  %v195_v31 = vpop.f32.mrf.mxu1 }
  0xd7   :  { %v439_v40 = vmul.f32 -0.5, %v423_v14  ;;  %v196_v19 = vadd.f32 %v195_v31, %v130_v16 }
  0xd8   :  { %v470_v23 = vmul.f32 1.442695, %v446_v17  ;;  %v399_v24 = vmul.f32 2.0, %v217_v18  ;;  %v377_v17 = vadd.f32 %v1361_v54, %v1327_v39  ;;  %v384_v18 = vadd.f32 %v1361_v54, %v1339_v46 }
  0xd9   :  { %v954_v25 = vpop.eup %953  ;;  %v456_v27 = vmul.f32 1.442695, %v439_v40  ;;  %v392_v28 = vmul.f32 2.0, %v196_v19  ;;  %v1496_v39 = vadd.s32 16, %v1343_v48 }
  0xda   :  { %486 = vst [vmem:[#allocation5] sm:$0xff] %v954_v25  ;;  %955 = vpow2.f32 %v470_v23  ;;  %v415_v32 = vsub.f32 %v383_v22, %v399_v24  ;;  %v801_v33 = vsel %vm785_vm7, %v954_v25, 0.0  ;;  %v656_v47 = vmul.f32 1.442695, %v954_v25  ;;  %vm793_vm7 = vmand %vm550_vm11, %vm632_vm8 }
  0xdb   :  { %957 = vpow2.f32 %v456_v27  ;;  %v408_v35 = vsub.f32 %v376_v20, %v392_v28  ;;  %817 = vadd.xlane.f32.xlu2 %v801_v33  ;;  %vm544_vm8 = vcmp.ne.s32.totalorder %v1496_v39, %v1345_v49 }
  0xdc   :  { %v154_v36 = vpop.f32.mrf.mxu2  ;;  %v431_v37 = vmax.f32 %v415_v32, 0.0  ;;  %959 = vpow2.f32 %v656_v47  ;;  %v1502_v32 = vadd.s32 72, %v1343_v48 }
  0xdd   :  { %v424_v44 = vmax.f32 %v408_v35, 0.0  ;;  %v219_v56 = vpop.f32.mrf.mxu3  ;;  %v133_v60 = vpop.f32.mrf.mxu0 }
  0xde   :  { %v447_v4 = vmul.f32 -0.5, %v431_v37  ;;  %v220_v5 = vadd.f32 %v219_v56, %v154_v36  ;;  %v198_v13 = vpop.f32.mrf.mxu1  ;;  %vm551_vm12 = vcmp.ne.s32.totalorder %v1502_v32, %v1345_v49 }
  0xdf   :  { %v440_v14 = vmul.f32 -0.5, %v424_v44  ;;  %v199_v15 = vadd.f32 %v198_v13, %v133_v60 }
  0xe0   :  { %v956_v16 = vpop.eup %955  ;;  %v472_v31 = vmul.f32 1.442695, %v447_v4  ;;  %v400_v40 = vmul.f32 2.0, %v220_v5 }
  0xe1   :  { %v958_v19 = vpop.eup %957  ;;  %494 = vst [vmem:[#allocation5 + $0x40] sm:$0xff] %v956_v16  ;;  %v458_v20 = vmul.f32 1.442695, %v440_v14  ;;  %v393_v22 = vmul.f32 2.0, %v199_v15  ;;  %v809_v23 = vsel %vm793_vm7, %v956_v16, 0.0  ;;  %v378_v14 = vadd.f32 %v1361_v54, %v1281_v21 }
  0xe2   :  { %v960_v46 = vpop.eup %959  ;;  %487 = vst [vmem:[#allocation5 + $0x8] sm:$0xff] %v958_v19  ;;  %961 = vpow2.f32 %v472_v31  ;;  %v416_v10 = vsub.f32 %v384_v18, %v400_v40  ;;  %833 = vadd.xlane.f32.xlu1 %v809_v23  ;;  %v802_v24 = vsel %vm786_vm3, %v958_v19, 0.0  ;;  %v672_v25 = vmul.f32 1.442695, %v956_v16 }
  0xe3   :  { %963 = vpow2.f32 %v458_v20  ;;  %v409_v27 = vsub.f32 %v377_v17, %v393_v22  ;;  %819 = vadd.xlane.f32.xlu0 %v802_v24  ;;  %v688_v45 = vsel %vm542_vm1, %v960_v46, 0.0  ;;  %v658_v37 = vmul.f32 1.442695, %v958_v19 }
  0xe4   :  { %v157_v28 = vpop.f32.mrf.mxu2  ;;  %v432_v33 = vmax.f32 %v416_v10, 0.0  ;;  %704 = vadd.xlane.f32.xlu2 %v688_v45  ;;  %965 = vpow2.f32 %v672_v25  ;;  %vm626_vm3 = vcmp.eq.s32.totalorder %v1395_v1, %v1366_v55  ;;  %vm633_vm1 = vcmp.eq.s32.totalorder %v1425_v9, %v1366_v55 }
  0xe5   :  { %v425_v47 = vmax.f32 %v409_v27, 0.0  ;;  %v222_v35 = vpop.f32.mrf.mxu3  ;;  %v136_v36 = vpop.f32.mrf.mxu0  ;;  %v385_v15 = vadd.f32 %v1361_v54, %v1325_v38  ;;  %vm787_vm7 = vmand %vm544_vm8, %vm626_vm3  ;;  %967 = vpow2.f32 %v658_v37  ;;  %v1523_v19 = vadd.s32 24, %v1343_v48 }
  0xe6   :  { %v448_v44 = vmul.f32 -0.5, %v432_v33  ;;  %v223_v56 = vadd.f32 %v222_v35, %v157_v28  ;;  %v201_v60 = vpop.f32.mrf.mxu1  ;;  %vm794_vm6 = vmand %vm551_vm12, %vm633_vm1  ;;  %vm627_vm3 = vcmp.eq.s32.totalorder %v1393_v0, %v1366_v55 }
  0xe7   :  { %v441_v4 = vmul.f32 -0.5, %v425_v47  ;;  %v202_v5 = vadd.f32 %v201_v60, %v136_v36 }
  0xe8   :  { %v962_v13 = vpop.eup %961  ;;  %v474_v16 = vmul.f32 1.442695, %v448_v44  ;;  %v401_v17 = vmul.f32 2.0, %v223_v56  ;;  %v379_v44 = vadd.f32 %v1361_v54, %v1295_v26  ;;  %v386_v56 = vadd.f32 %v1361_v54, %v1356_v53 }
  0xe9   :  { %v964_v18 = vpop.eup %963  ;;  %495 = vst [vmem:[#allocation5 + $0x48] sm:$0xff] %v962_v13  ;;  %v460_v31 = vmul.f32 1.442695, %v441_v4  ;;  %v394_v40 = vmul.f32 2.0, %v202_v5  ;;  %v674_v1 = vmul.f32 1.442695, %v962_v13 }
  0xea   :  { %v966_v21 = vpop.eup %965  ;;  %488 = vst [vmem:[#allocation5 + $0x10] sm:$0xff] %v964_v18  ;;  %969 = vpow2.f32 %v474_v16  ;;  %v417_v38 = vsub.f32 %v385_v15, %v401_v17  ;;  %v803_v20 = vsel %vm787_vm7, %v964_v18, 0.0  ;;  %v810_v10 = vsel %vm794_vm6, %v962_v13, 0.0 }
  0xeb   :  { %971 = vpow2.f32 %v460_v31  ;;  %v410_v22 = vsub.f32 %v378_v14, %v394_v40  ;;  %v696_v23 = vsel %vm550_vm11, %v966_v21, 0.0  ;;  %821 = vadd.xlane.f32.xlu1 %v803_v20  ;;  %v660_v28 = vmul.f32 1.442695, %v964_v18  ;;  %v968_v59 = vpop.eup %967 }
  0xec   :  { %v160_v46 = vpop.f32.mrf.mxu2  ;;  %v433_v24 = vmax.f32 %v417_v38, 0.0  ;;  %720 = vadd.xlane.f32.xlu0 %v696_v23  ;;  %835 = vadd.xlane.f32.xlu2 %v810_v10  ;;  %973 = vpow2.f32 %v674_v1  ;;  %vm545_vm11 = vcmp.ne.s32.totalorder %v1523_v19, %v1345_v49  ;;  %v514_v26 = vadd.s32 80, %v1343_v48 }
  0xed   :  { %v426_v25 = vmax.f32 %v410_v22, 0.0  ;;  %v225_v9 = vpop.f32.mrf.mxu3  ;;  %v139_v27 = vpop.f32.mrf.mxu0  ;;  %vm1551_vm6 = vmand %vm545_vm11, %vm627_vm3  ;;  %975 = vpow2.f32 %v660_v28  ;;  %v689_v31 = vsel %vm543_vm15, %v968_v59, 0.0  ;;  %vm634_vm15 = vcmp.eq.s32.totalorder %v1391_v63, %v1366_v55 }
  0xee   :  { %v449_v45 = vmul.f32 -0.5, %v433_v24  ;;  %v226_v33 = vadd.f32 %v225_v9, %v160_v46  ;;  %v204_v47 = vpop.f32.mrf.mxu1  ;;  %vm552_vm1 = vcmp.ne.s32.totalorder %v514_v26, %v1345_v49  ;;  %vm635_vm7 = vcmp.eq.s32.totalorder %v1431_v12, %v1366_v55 }
  0xef   :  { %v442_v35 = vmul.f32 -0.5, %v426_v25  ;;  %v205_v36 = vadd.f32 %v204_v47, %v139_v27  ;;  %v387_v27 = vadd.f32 %v1361_v54, %v1354_v52  ;;  %v380_v47 = vadd.f32 %v1361_v54, %v1335_v43 }
  0xf0   :  { %v1538_v37 = vpop.eup %969  ;;  %v476_v60 = vmul.f32 1.442695, %v449_v45  ;;  %v402_v4 = vmul.f32 2.0, %v226_v33  ;;  %v1581_v52 = vadd.s32 88, %v1343_v48  ;;  %v1584_v43 = vadd.s32 32, %v1343_v48 }
  0xf1   :  { %v972_v5 = vpop.eup %971  ;;  %496 = vst [vmem:[#allocation5 + $0x50] sm:$0xff] %v1538_v37  ;;  %v462_v13 = vmul.f32 1.442695, %v442_v35  ;;  %v395_v14 = vmul.f32 2.0, %v205_v36  ;;  %v676_v18 = vmul.f32 1.442695, %v1538_v37  ;;  %vm628_vm3 = vcmp.eq.s32.totalorder %v1352_v51, %v1366_v55 }
  0xf2   :  { %v974_v53 = vpop.eup %973  ;;  %489 = vst [vmem:[#allocation5 + $0x18] sm:$0xff] %v972_v5  ;;  %977 = vpow2.f32 %v476_v60  ;;  %v418_v16 = vsub.f32 %v386_v56, %v402_v4  ;;  %v804_v17 = vsel %vm1551_vm6, %v972_v5, 0.0  ;;  %v662_v23 = vmul.f32 1.442695, %v972_v5 }
  0xf3   :  { %979 = vpow2.f32 %v462_v13  ;;  %v411_v0 = vsub.f32 %v379_v44, %v395_v14  ;;  %v697_v40 = vsel %vm551_vm12, %v974_v53, 0.0  ;;  %v976_v25 = vpop.eup %975  ;;  %vm795_vm12 = vmand %vm552_vm1, %vm634_vm15  ;;  %vm546_vm6 = vcmp.ne.s32.totalorder %v1584_v43, %v1345_v49 }
  0xf4   :  { %v163_v21 = vpop.f32.mrf.mxu2  ;;  %v434_v38 = vmax.f32 %v418_v16, 0.0  ;;  %706 = vadd.xlane.f32.xlu0 %v689_v31  ;;  %722 = vadd.xlane.f32.xlu1 %v697_v40  ;;  %981 = vpow2.f32 %v676_v18  ;;  %v811_v60 = vsel %vm795_vm12, %v1538_v37, 0.0  ;;  %v690_v4 = vsel %vm544_vm8, %v976_v25, 0.0 }
  0xf5   :  { %v427_v20 = vmax.f32 %v411_v0, 0.0  ;;  %v228_v1 = vpop.f32.mrf.mxu3  ;;  %823 = vadd.xlane.f32.xlu2 %v804_v17  ;;  %v142_v22 = vpop.f32.mrf.mxu0  ;;  %983 = vpow2.f32 %v662_v23  ;;  %vm553_vm8 = vcmp.ne.s32.totalorder %v1581_v52, %v1345_v49  ;;  %v381_v40 = vadd.f32 %v1361_v54, %v1333_v42 }
  0xf6   :  { %v450_v46 = vmul.f32 -0.5, %v434_v38  ;;  %v229_v10 = vadd.f32 %v228_v1, %v163_v21  ;;  %v207_v24 = vpop.f32.mrf.mxu1  ;;  %v388_v21 = vadd.f32 %v1361_v54, %v1331_v41  ;;  %vm796_vm15 = vmand %vm553_vm8, %vm635_vm7  ;;  %v1615_v42 = vadd.s32 40, %v1343_v48 }
  0xf7   :  { %v443_v30 = vmul.f32 -0.5, %v427_v20  ;;  %v208_v32 = vadd.f32 %v207_v24, %v142_v22  ;;  %v516_v12 = vadd.s32 96, %v1343_v48  ;;  %vm629_vm7 = vcmp.eq.s32.totalorder %v1407_v6, %v1366_v55 }
  0xf8   :  { %v1568_v9 = vpop.eup %977  ;;  %v478_v28 = vmul.f32 1.442695, %v450_v46  ;;  %v403_v45 = vmul.f32 2.0, %v229_v10  ;;  %vm547_vm12 = vcmp.ne.s32.totalorder %v1615_v42, %v1345_v49 }
  0xf9   :  { %v980_v33 = vpop.eup %979  ;;  %497 = vst [vmem:[#allocation5 + $0x58] sm:$0xff] %v1568_v9  ;;  %v464_v59 = vmul.f32 1.442695, %v443_v30  ;;  %v396_v35 = vmul.f32 2.0, %v208_v32  ;;  %v678_v16 = vmul.f32 1.442695, %v1568_v9 }
  0xfa   :  { %v982_v36 = vpop.eup %981  ;;  %490 = vst [vmem:[#allocation5 + $0x20] sm:$0xff] %v980_v33  ;;  %985 = vpow2.f32 %v478_v28  ;;  %v419_v44 = vsub.f32 %v387_v27, %v403_v45  ;;  %v812_v54 = vsel %vm796_vm15, %v1568_v9, 0.0  ;;  %v664_v25 = vmul.f32 1.442695, %v980_v33  ;;  %vm790_vm15 = vmand %vm547_vm12, %vm629_vm7 }
  0xfb   :  { %987 = vpow2.f32 %v464_v59  ;;  %v412_v56 = vsub.f32 %v380_v47, %v396_v35  ;;  %v698_v63 = vsel %vm552_vm1, %v982_v36, 0.0  ;;  %v984_v18 = vpop.eup %983  ;;  %vm789_vm1 = vmand %vm546_vm6, %vm628_vm3  ;;  %vm554_vm3 = vcmp.ne.s32.totalorder %v516_v12, %v1345_v49 }
  0xfc   :  { %v166_v5 = vpop.f32.mrf.mxu2  ;;  %v435_v13 = vmax.f32 %v419_v44, 0.0  ;;  %837 = vadd.xlane.f32.xlu0 %v811_v60  ;;  %708 = vadd.xlane.f32.xlu1 %v690_v4  ;;  %989 = vpow2.f32 %v678_v16  ;;  %v805_v10 = vsel %vm789_vm1, %v980_v33, 0.0  ;;  %v691_v32 = vsel %vm545_vm11, %v984_v18, 0.0 }
  0xfd   :  { %v428_v14 = vmax.f32 %v412_v56, 0.0  ;;  %v231_v15 = vpop.f32.mrf.mxu3  ;;  %724 = vadd.xlane.f32.xlu2 %v698_v63  ;;  %v145_v53 = vpop.f32.mrf.mxu0  ;;  %vm636_vm11 = vcmp.eq.s32.totalorder %v1429_v11, %v1366_v55 }
  0xfe   :  { %v451_v37 = vmul.f32 -0.5, %v435_v13  ;;  %v232_v17 = vadd.f32 %v231_v15, %v166_v5  ;;  %v210_v39 = vpop.f32.mrf.mxu1  ;;  %vm797_vm1 = vmand %vm554_vm3, %vm636_vm11 }
  0xff   :  { %v444_v26 = vmul.f32 -0.5, %v428_v14  ;;  %v211_v0 = vadd.f32 %v210_v39, %v145_v53 }
 0x100   :  { %v1601_v31 = vpop.eup %985  ;;  %v480_v38 = vmul.f32 1.442695, %v451_v37  ;;  %v404_v20 = vmul.f32 2.0, %v232_v17 }
 0x101   :  { %v988_v1 = vpop.eup %987  ;;  %498 = vst [vmem:[#allocation5 + $0x60] sm:$0xff] %v1601_v31  ;;  %v466_v22 = vmul.f32 1.442695, %v444_v26  ;;  %v397_v23 = vmul.f32 2.0, %v211_v0  ;;  %v680_v51 = vmul.f32 1.442695, %v1601_v31 }
 0x102   :  { %491 = vst [vmem:[#allocation5 + $0x28] sm:$0xff] %v988_v1  ;;  %991 = vpow2.f32 %v480_v38  ;;  %v420_v41 = vsub.f32 %v388_v21, %v404_v20  ;;  %v666_v28 = vmul.f32 1.442695, %v988_v1  ;;  %v990_v47 = vpop.eup %989  ;;  %v806_v13 = vsel %vm790_vm15, %v988_v1, 0.0 }
 0x103   :  { %993 = vpow2.f32 %v466_v22  ;;  %v413_v46 = vsub.f32 %v381_v40, %v397_v23  ;;  %v699_v5 = vsel %vm553_vm8, %v990_v47, 0.0  ;;  %v813_v6 = vsel %vm797_vm1, %v1601_v31, 0.0 }
 0x104   :  { %v169_v24 = vpop.f32.mrf.mxu2  ;;  %v436_v30 = vmax.f32 %v420_v41, 0.0  ;;  %839 = vadd.xlane.f32.xlu1 %v812_v54  ;;  %825 = vadd.xlane.f32.xlu0 %v805_v10  ;;  %995 = vpow2.f32 %v664_v25  ;;  %v1073_v31 = vmov 0.0  }
 0x105   :  { %v429_v9 = vmax.f32 %v413_v46, 0.0  ;;  %v234_v27 = vpop.f32.mrf.mxu3  ;;  %710 = vadd.xlane.f32.xlu2 %v691_v32  ;;  %997 = vpow2.f32 %v680_v51 }
 0x106   :  { %v452_v45 = vmul.f32 -0.5, %v436_v30  ;;  %v235_v48 = vadd.f32 %v234_v27, %v169_v24  ;;  %999 = vpow2.f32 %v666_v28 }
 0x107   :  { %v445_v33 = vmul.f32 -0.5, %v429_v9 }
 0x108   :  { %v1634_v19 = vpop.eup %991  ;;  %v482_v59 = vmul.f32 1.442695, %v452_v45  ;;  %v405_v35 = vmul.f32 2.0, %v235_v48 }
 0x109   :  { %v994_v36 = vpop.eup %993  ;;  %499 = vst [vmem:[#allocation5 + $0x68] sm:$0xff] %v1634_v19  ;;  %v468_v44 = vmul.f32 1.442695, %v445_v33  ;;  %v682_v62 = vmul.f32 1.442695, %v1634_v19 }
 0x10a   :  { %492 = vst [vmem:[#allocation5 + $0x30] sm:$0xff] %v994_v36  ;;  %1001 = vpow2.f32 %v482_v59  ;;  %v421_v56 = vsub.f32 %v1377_v61, %v405_v35  ;;  %v668_v60 = vmul.f32 1.442695, %v994_v36  ;;  %v807_v4 = vsel %vm1421_vm10, %v994_v36, 0.0  ;;  %v996_v8 = vpop.eup %995 }
 0x10b   :  { %1003 = vpow2.f32 %v468_v44  ;;  %v998_v63 = vpop.eup %997  ;;  %v692_v26 = vsel %vm546_vm6, %v996_v8, 0.0 }
 0x10c   :  { %v437_v61 = vmax.f32 %v421_v56, 0.0  ;;  %726 = vadd.xlane.f32.xlu0 %v699_v5  ;;  %827 = vadd.xlane.f32.xlu1 %v806_v13  ;;  %1005 = vpow2.f32 %v668_v60  ;;  %v1000_v15 = vpop.eup %999  ;;  %v700_v17 = vsel %vm554_vm3, %v998_v63, 0.0 }
 0x10d   :  { %841 = vadd.xlane.f32.xlu2 %v813_v6  ;;  %v693_v39 = vsel %vm547_vm12, %v1000_v15, 0.0 }
 0x10e   :  { %v453_v14 = vmul.f32 -0.5, %v437_v61 }
 0x110   :  { %v1657_v52 = vpop.eup %1001  ;;  %v484_v53 = vmul.f32 1.442695, %v453_v14 }
 0x111   :  { %v1004_v16 = vpop.eup %1003  ;;  %500 = vst [vmem:[#allocation5 + $0x70] sm:$0xff] %v1657_v52  ;;  %v684_v0 = vmul.f32 1.442695, %v1657_v52 }
 0x112   :  { %v1006_v55 = vpop.eup %1005  ;;  %493 = vst [vmem:[#allocation5 + $0x38] sm:$0xff] %v1004_v16  ;;  %1007 = vpow2.f32 %v484_v53  ;;  %v808_v11 = vsel %vm1387_vm4, %v1004_v16, 0.0  ;;  %v670_v37 = vmul.f32 1.442695, %v1004_v16  ;;  %vm241_vm4 = vcmask 7168  }
 0x113   :  { %v694_v18 = vsel %vm548_vm0, %v1006_v55, 0.0  ;;  %258 = vst.msk [vmem:[%s2090_s8] sm:$0xff] %vm241_vm4, %v1073_v31  ;;  %vm2105_vm0 = vcmp.ne.s32.totalorder %v1401_v3, %v1345_v49 }
 0x114   :  { %728 = vadd.xlane.f32.xlu1 %v700_v17  ;;  %714 = vadd.xlane.f32.xlu0 %v693_v39  ;;  %1009 = vpow2.f32 %v670_v37  ;;  %242 = vst.msk [vmem:[%s2089_s7] sm:$0xff] %vm241_vm4, %v1073_v31 }
 0x115   :  { %712 = vadd.xlane.f32.xlu2 %v692_v26  ;;  %243 = vst.msk [vmem:[%s2089_s7 + $0x8] sm:$0xff] %vm241_vm4, %v1073_v31  ;;  %1011 = vpow2.f32 %v682_v62 }
 0x116   :  { %1013 = vpow2.f32 %v684_v0  ;;  %244 = vst.msk [vmem:[%s2089_s7 + $0x10] sm:$0xff] %vm241_vm4, %v1073_v31 }
 0x117   :  { %245 = vst.msk [vmem:[%s2089_s7 + $0x18] sm:$0xff] %vm241_vm4, %v1073_v31 }
 0x118   :  { %v1008_v50 = vpop.eup %1007  ;;  %246 = vst.msk [vmem:[%s2089_s7 + $0x20] sm:$0xff] %vm241_vm4, %v1073_v31 }
 0x119   :  { %501 = vst [vmem:[#allocation5 + $0x78] sm:$0xff] %v1008_v50  ;;  %v686_v43 = vmul.f32 1.442695, %v1008_v50  ;;  %v816_v40 = vsel %vm1446_vm14, %v1008_v50, 0.0 }
 0x11a   :  { %v1010_v21 = vpop.eup %1009  ;;  %247 = vst.msk [vmem:[%s2089_s7 + $0x28] sm:$0xff] %vm241_vm4, %v1073_v31  ;;  %v769_v3 = vld [vmem:[%s2090_s8] sm:$0xff] }
 0x11b   :  { %1015 = vpow2.f32 %v686_v43  ;;  %v695_v38 = vsel %vm549_vm2, %v1010_v21, 0.0  ;;  %248 = vst.msk [vmem:[%s2089_s7 + $0x30] sm:$0xff] %vm241_vm4, %v1073_v31  ;;  %v1012_v57 = vpop.eup %1011  ;;  %vm2106_vm2 = vcmp.ne.s32.totalorder %v1372_v58, %v1345_v49  ;;  %v815_v49 = vsel %vm1439_vm13, %v1657_v52, 0.0  ;;  %v640_v54 = vld [vmem:[%s2089_s7] sm:$0xff] }
 0x11c   :  { %716 = vadd.xlane.f32.xlu1 %v694_v18  ;;  %831 = vadd.xlane.f32.xlu0 %v808_v11  ;;  %249 = vst.msk [vmem:[%s2089_s7 + $0x38] sm:$0xff] %vm241_vm4, %v1073_v31  ;;  %v1014_v34 = vpop.eup %1013  ;;  %v701_v2 = vsel %vm2106_vm2, %v1012_v57, 0.0  ;;  %v814_v58 = vsel %vm1414_vm9, %v1634_v19, 0.0  ;;  %v641_v33 = vld [vmem:[%s2089_s7 + $0x8] sm:$0xff] }
 0x11d   :  { %829 = vadd.xlane.f32.xlu2 %v807_v4  ;;  %250 = vst.msk [vmem:[%s2089_s7 + $0x40] sm:$0xff] %vm241_vm4, %v1073_v31  ;;  %v702_v22 = vsel %vm2105_vm0, %v1014_v34, 0.0  ;;  %v642_v13 = vld [vmem:[%s2089_s7 + $0x10] sm:$0xff] }
 0x11e   :  { %251 = vst.msk [vmem:[%s2089_s7 + $0x48] sm:$0xff] %vm241_vm4, %v1073_v31  ;;  %v643_v55 = vld [vmem:[%s2089_s7 + $0x18] sm:$0xff] }
 0x11f   :  { %252 = vst.msk [vmem:[%s2089_s7 + $0x50] sm:$0xff] %vm241_vm4, %v1073_v31 }
 0x120   :  { %253 = vst.msk [vmem:[%s2089_s7 + $0x58] sm:$0xff] %vm241_vm4, %v1073_v31 }
 0x121   :  { %v1016_v20 = vpop.eup %1015  ;;  %254 = vst.msk [vmem:[%s2089_s7 + $0x60] sm:$0xff] %vm241_vm4, %v1073_v31 }
 0x122   :  { %v703_v1 = vsel %vm557_vm5, %v1016_v20, 0.0  ;;  %255 = vst.msk [vmem:[%s2089_s7 + $0x68] sm:$0xff] %vm241_vm4, %v1073_v31  ;;  %v645_v20 = vld [vmem:[%s2089_s7 + $0x28] sm:$0xff] }
 0x123   :  { %256 = vst.msk [vmem:[%s2089_s7 + $0x70] sm:$0xff] %vm241_vm4, %v1073_v31 }
 0x124   :  { %734 = vadd.xlane.f32.xlu1 %v703_v1  ;;  %732 = vadd.xlane.f32.xlu0 %v702_v22  ;;  %257 = vst.msk [vmem:[%s2089_s7 + $0x78] sm:$0xff] %vm241_vm4, %v1073_v31  ;;  %v648_v32 = vld [vmem:[%s2089_s7 + $0x40] sm:$0xff] }
 0x125   :  { %730 = vadd.xlane.f32.xlu2 %v701_v2  ;;  %259 = vst.msk [vmem:[%s2090_s8 + $0x8] sm:$0xff] %vm241_vm4, %v1073_v31  ;;  %v649_v19 = vld [vmem:[%s2089_s7 + $0x48] sm:$0xff]  ;;  %v644_v1 = vld [vmem:[%s2089_s7 + $0x20] sm:$0xff] }
 0x126   :  { %260 = vst.msk [vmem:[%s2090_s8 + $0x10] sm:$0xff] %vm241_vm4, %v1073_v31  ;;  %v650_v61 = vld [vmem:[%s2089_s7 + $0x50] sm:$0xff] }
 0x127   :  { %261 = vst.msk [vmem:[%s2090_s8 + $0x18] sm:$0xff] %vm241_vm4, %v1073_v31  ;;  %v651_v62 = vld [vmem:[%s2089_s7 + $0x58] sm:$0xff] }
 0x128   :  { %262 = vst.msk [vmem:[%s2090_s8 + $0x20] sm:$0xff] %vm241_vm4, %v1073_v31  ;;  %v652_v34 = vld [vmem:[%s2089_s7 + $0x60] sm:$0xff] }
 0x129   :  { %263 = vst.msk [vmem:[%s2090_s8 + $0x28] sm:$0xff] %vm241_vm4, %v1073_v31 }
 0x12a   :  { %264 = vst.msk [vmem:[%s2090_s8 + $0x30] sm:$0xff] %vm241_vm4, %v1073_v31 }
 0x12b   :  { %265 = vst.msk [vmem:[%s2090_s8 + $0x38] sm:$0xff] %vm241_vm4, %v1073_v31 }
 0x12c   :  { %845 = vadd.xlane.f32.xlu1 %v815_v49  ;;  %843 = vadd.xlane.f32.xlu0 %v814_v58  ;;  %266 = vst.msk [vmem:[%s2090_s8 + $0x40] sm:$0xff] %vm241_vm4, %v1073_v31  ;;  %v770_v42 = vld [vmem:[%s2090_s8 + $0x8] sm:$0xff] }
 0x12d   :  { %718 = vadd.xlane.f32.xlu2 %v695_v38  ;;  %267 = vst.msk [vmem:[%s2090_s8 + $0x48] sm:$0xff] %vm241_vm4, %v1073_v31  ;;  %v771_v30 = vld [vmem:[%s2090_s8 + $0x10] sm:$0xff] }
 0x12e   :  { %268 = vst.msk [vmem:[%s2090_s8 + $0x50] sm:$0xff] %vm241_vm4, %v1073_v31  ;;  %v772_v59 = vld [vmem:[%s2090_s8 + $0x18] sm:$0xff] }
 0x12f   :  { %269 = vst.msk [vmem:[%s2090_s8 + $0x58] sm:$0xff] %vm241_vm4, %v1073_v31  ;;  %v773_v16 = vld [vmem:[%s2090_s8 + $0x20] sm:$0xff] }
 0x130   :  { %270 = vst.msk [vmem:[%s2090_s8 + $0x60] sm:$0xff] %vm241_vm4, %v1073_v31  ;;  %v774_v0 = vld [vmem:[%s2090_s8 + $0x28] sm:$0xff] }
 0x131   :  { %271 = vst.msk [vmem:[%s2090_s8 + $0x68] sm:$0xff] %vm241_vm4, %v1073_v31 }
 0x132   :  { %272 = vst.msk [vmem:[%s2090_s8 + $0x70] sm:$0xff] %vm241_vm4, %v1073_v31 }
 0x133   :  { %273 = vst.msk [vmem:[%s2090_s8 + $0x78] sm:$0xff] %vm241_vm4, %v1073_v31  ;;  %v777_v23 = vld [vmem:[%s2090_s8 + $0x40] sm:$0xff] }
 0x134   :  { %893 = dma.vmem_to_hbm [thread:$0]  %s886_s18, 2048, %s888_s3, [#allocation4], %s1075_s30, %s1075_s30, %s1076_s9  }
 0x135   :  { %847 = vadd.xlane.f32.xlu2 %v816_v40  ;;  %v778_v51 = vld [vmem:[%s2090_s8 + $0x48] sm:$0xff]  ;;  %v779_v5 = vld [vmem:[%s2090_s8 + $0x50] sm:$0xff] }
 0x136   :  { %v780_v53 = vld [vmem:[%s2090_s8 + $0x58] sm:$0xff] }
 0x137   :  { %v781_v31 = vld [vmem:[%s2090_s8 + $0x60] sm:$0xff] }
 0x14e   :  { %v818_v7 = vpop.xlane.xlu2 %817 }
 0x14f   :  { %v849_v29 = vadd.f32 %v818_v7, %v769_v3 }
 0x151   :  { %865 = vst.msk [vmem:[%s2090_s8] sm:$0xff] %vm241_vm4, %v849_v29  ;;  %v646_v29 = vld [vmem:[%s2089_s7 + $0x30] sm:$0xff] }
 0x155   :  { %v834_v41 = vpop.xlane.xlu1 %833 }
 0x156   :  { %v857_v12 = vadd.f32 %v834_v41, %v777_v23  ;;  %v820_v46 = vpop.xlane.xlu0 %819  ;;  %v776_v23 = vld [vmem:[%s2090_s8 + $0x38] sm:$0xff] }
 0x157   :  { %v850_v10 = vadd.f32 %v820_v46, %v770_v42  ;;  %v705_v24 = vpop.xlane.xlu2 %704  ;;  %v775_v42 = vld [vmem:[%s2090_s8 + $0x30] sm:$0xff] }
 0x158   :  { %873 = vst.msk [vmem:[%s2090_s8 + $0x40] sm:$0xff] %vm241_vm4, %v857_v12  ;;  %v736_v25 = vadd.f32 %v705_v24, %v640_v54 }
 0x159   :  { %866 = vst.msk [vmem:[%s2090_s8 + $0x8] sm:$0xff] %vm241_vm4, %v850_v10 }
 0x15a   :  { %753 = vst.msk [vmem:[%s2089_s7] sm:$0xff] %vm241_vm4, %v736_v25  ;;  %v655_v25 = vld [vmem:[%s2089_s7 + $0x78] sm:$0xff] }
 0x15e   :  { %v822_v9 = vpop.xlane.xlu1 %821 }
 0x15f   :  { %v721_v27 = vpop.xlane.xlu0 %720  ;;  %v851_v28 = vadd.f32 %v822_v9, %v771_v30  ;;  %v836_v45 = vpop.xlane.xlu2 %835  ;;  %v654_v30 = vld [vmem:[%s2089_s7 + $0x70] sm:$0xff] }
 0x160   :  { %v744_v48 = vadd.f32 %v721_v27, %v648_v32  ;;  %v858_v47 = vadd.f32 %v836_v45, %v778_v51  ;;  %v653_v32 = vld [vmem:[%s2089_s7 + $0x68] sm:$0xff] }
 0x161   :  { %867 = vst.msk [vmem:[%s2090_s8 + $0x10] sm:$0xff] %vm241_vm4, %v851_v28 }
 0x162   :  { %761 = vst.msk [vmem:[%s2089_s7 + $0x40] sm:$0xff] %vm241_vm4, %v744_v48 }
 0x163   :  { %874 = vst.msk [vmem:[%s2090_s8 + $0x48] sm:$0xff] %vm241_vm4, %v858_v47  ;;  %v783_v47 = vld [vmem:[%s2090_s8 + $0x70] sm:$0xff] }
 0x167   :  { %v707_v35 = vpop.xlane.xlu0 %706  ;;  %v723_v36 = vpop.xlane.xlu1 %722 }
 0x168   :  { %v737_v44 = vadd.f32 %v707_v35, %v641_v33  ;;  %v745_v56 = vadd.f32 %v723_v36, %v649_v19  ;;  %v824_v60 = vpop.xlane.xlu2 %823  ;;  %v782_v33 = vld [vmem:[%s2090_s8 + $0x68] sm:$0xff]  ;;  %v647_v19 = vld [vmem:[%s2089_s7 + $0x38] sm:$0xff] }
 0x169   :  { %v852_v4 = vadd.f32 %v824_v60, %v772_v59 }
 0x16a   :  { %754 = vst.msk [vmem:[%s2089_s7 + $0x8] sm:$0xff] %vm241_vm4, %v737_v44 }
 0x16b   :  { %762 = vst.msk [vmem:[%s2089_s7 + $0x48] sm:$0xff] %vm241_vm4, %v745_v56 }
 0x16c   :  { %868 = vst.msk [vmem:[%s2090_s8 + $0x18] sm:$0xff] %vm241_vm4, %v852_v4  ;;  %v784_v4 = vld [vmem:[%s2090_s8 + $0x78] sm:$0xff] }
 0x16f   :  { %v838_v6 = vpop.xlane.xlu0 %837  ;;  %v709_v8 = vpop.xlane.xlu1 %708 }
 0x170   :  { %v859_v63 = vadd.f32 %v838_v6, %v779_v5  ;;  %v738_v14 = vadd.f32 %v709_v8, %v642_v13  ;;  %v725_v15 = vpop.xlane.xlu2 %724 }
 0x171   :  { %v746_v52 = vadd.f32 %v725_v15, %v650_v61 }
 0x172   :  { %875 = vst.msk [vmem:[%s2090_s8 + $0x50] sm:$0xff] %vm241_vm4, %v859_v63 }
 0x173   :  { %755 = vst.msk [vmem:[%s2089_s7 + $0x10] sm:$0xff] %vm241_vm4, %v738_v14 }
 0x174   :  { %763 = vst.msk [vmem:[%s2089_s7 + $0x50] sm:$0xff] %vm241_vm4, %v746_v52 }
 0x177   :  { %v840_v11 = vpop.xlane.xlu1 %839  ;;  %v826_v37 = vpop.xlane.xlu0 %825 }
 0x178   :  { %v860_v17 = vadd.f32 %v840_v11, %v780_v53  ;;  %v853_v39 = vadd.f32 %v826_v37, %v773_v16  ;;  %v711_v18 = vpop.xlane.xlu2 %710 }
 0x179   :  { %v739_v26 = vadd.f32 %v711_v18, %v643_v55 }
 0x17a   :  { %876 = vst.msk [vmem:[%s2090_s8 + $0x58] sm:$0xff] %vm241_vm4, %v860_v17 }
 0x17b   :  { %869 = vst.msk [vmem:[%s2090_s8 + $0x20] sm:$0xff] %vm241_vm4, %v853_v39 }
 0x17c   :  { %756 = vst.msk [vmem:[%s2089_s7 + $0x18] sm:$0xff] %vm241_vm4, %v739_v26 }
 0x17f   :  { %v727_v50 = vpop.xlane.xlu0 %726  ;;  %v828_v43 = vpop.xlane.xlu1 %827 }
 0x180   :  { %v747_v40 = vadd.f32 %v727_v50, %v651_v62  ;;  %v854_v21 = vadd.f32 %v828_v43, %v774_v0  ;;  %v842_v38 = vpop.xlane.xlu2 %841 }
 0x181   :  { %v861_v57 = vadd.f32 %v842_v38, %v781_v31 }
 0x182   :  { %764 = vst.msk [vmem:[%s2089_s7 + $0x58] sm:$0xff] %vm241_vm4, %v747_v40 }
 0x183   :  { %870 = vst.msk [vmem:[%s2090_s8 + $0x28] sm:$0xff] %vm241_vm4, %v854_v21 }
 0x184   :  { %877 = vst.msk [vmem:[%s2090_s8 + $0x60] sm:$0xff] %vm241_vm4, %v861_v57 }
 0x187   :  { %v729_v22 = vpop.xlane.xlu1 %728  ;;  %v715_v2 = vpop.xlane.xlu0 %714 }
 0x188   :  { %v748_v49 = vadd.f32 %v729_v22, %v652_v34  ;;  %v741_v58 = vadd.f32 %v715_v2, %v645_v20  ;;  %v713_v3 = vpop.xlane.xlu2 %712 }
 0x189   :  { %v740_v7 = vadd.f32 %v713_v3, %v644_v1 }
 0x18a   :  { %765 = vst.msk [vmem:[%s2089_s7 + $0x60] sm:$0xff] %vm241_vm4, %v748_v49 }
 0x18b   :  { %758 = vst.msk [vmem:[%s2089_s7 + $0x28] sm:$0xff] %vm241_vm4, %v741_v58 }
 0x18c   :  { %757 = vst.msk [vmem:[%s2089_s7 + $0x20] sm:$0xff] %vm241_vm4, %v740_v7 }
 0x18f   :  { %v717_v41 = vpop.xlane.xlu1 %716  ;;  %v832_v54 = vpop.xlane.xlu0 %831 }
 0x190   :  { %v742_v12 = vadd.f32 %v717_v41, %v646_v29  ;;  %v856_v46 = vadd.f32 %v832_v54, %v776_v23  ;;  %v830_v10 = vpop.xlane.xlu2 %829 }
 0x191   :  { %v855_v24 = vadd.f32 %v830_v10, %v775_v42 }
 0x192   :  { %759 = vst.msk [vmem:[%s2089_s7 + $0x30] sm:$0xff] %vm241_vm4, %v742_v12 }
 0x193   :  { %872 = vst.msk [vmem:[%s2090_s8 + $0x38] sm:$0xff] %vm241_vm4, %v856_v46 }
 0x194   :  { %871 = vst.msk [vmem:[%s2090_s8 + $0x30] sm:$0xff] %vm241_vm4, %v855_v24 }
 0x197   :  { %v735_v51 = vpop.xlane.xlu1 %734  ;;  %v733_v9 = vpop.xlane.xlu0 %732 }
 0x198   :  { %v751_v27 = vadd.f32 %v735_v51, %v655_v25  ;;  %v750_v28 = vadd.f32 %v733_v9, %v654_v30  ;;  %v731_v45 = vpop.xlane.xlu2 %730 }
 0x199   :  { %v749_v48 = vadd.f32 %v731_v45, %v653_v32 }
 0x19a   :  { %768 = vst.msk [vmem:[%s2089_s7 + $0x78] sm:$0xff] %vm241_vm4, %v751_v27 }
 0x19b   :  { %767 = vst.msk [vmem:[%s2089_s7 + $0x70] sm:$0xff] %vm241_vm4, %v750_v28 }
 0x19c   :  { %766 = vst.msk [vmem:[%s2089_s7 + $0x68] sm:$0xff] %vm241_vm4, %v749_v48 }
 0x19f   :  { %v846_v59 = vpop.xlane.xlu1 %845  ;;  %v844_v35 = vpop.xlane.xlu0 %843 }
 0x1a0   :  { %v863_v36 = vadd.f32 %v846_v59, %v783_v47  ;;  %v862_v44 = vadd.f32 %v844_v35, %v782_v33  ;;  %v719_v56 = vpop.xlane.xlu2 %718 }
 0x1a1   :  { %v743_v60 = vadd.f32 %v719_v56, %v647_v19 }
 0x1a2   :  { %879 = vst.msk [vmem:[%s2090_s8 + $0x70] sm:$0xff] %vm241_vm4, %v863_v36 }
 0x1a3   :  { %878 = vst.msk [vmem:[%s2090_s8 + $0x68] sm:$0xff] %vm241_vm4, %v862_v44 }
 0x1a4   :  { %760 = vst.msk [vmem:[%s2089_s7 + $0x38] sm:$0xff] %vm241_vm4, %v743_v60 }
 0x1a8   :  { %v848_v5 = vpop.xlane.xlu2 %847 }
 0x1a9   :  { %v864_v13 = vadd.f32 %v848_v5, %v784_v4 }
 0x1ab   :  { %880 = vst.msk [vmem:[%s2090_s8 + $0x78] sm:$0xff] %vm241_vm4, %v864_v13 }
 0x1ac   :  { %1067 = dma.done.wait [#allocation4], 2048  }
 0x1ad   :  { %1068 = vsyncadd [#allocation4], 4294965248 }
 0x1ae   :  { %906 = vsyncpa [#allocation3], 1 }
 0x1af   :  { %907 = vsyncpa [#allocation4], 1 }

</bundles_post_ra>
